<compile_context>
chip_gen: v7x
topology: tpu7x:2x2x1
jax: 0.10.0
libtpu: 0.0.40
codegen_flags: <defaults>
</compile_context>

<pallas_src>
import numpy as np
import jax
import jax.numpy as jnp
from jax.experimental import pallas as pl
from jax.experimental.pallas import tpu as pltpu

D_IN = 4        # space_dimensions (=3) + time
HIDDEN = 32
D_OUT = 1       # dataclass.output_dimension
TILE_N = 2048   # sample points per grid step (lane dimension, multiple of 128)
NUM_CORES = 2   # leading "parallel" grid axis: both TCs on v7x, harmless elsewhere


# ----------------------------------------------------------------------------
# Fused kernel: tanh MLP forward + masked sum-of-squares partial reductions.
# Per-core partials go to a lane-dense (1,1,128) output block; the scalar
# epilogue (weight norms, lambda combine, log10) is done in XLA outside.
# ----------------------------------------------------------------------------
def _make_fused_kernel(n_pts, n_res, tiles_per_core, tile_n):
    def kernel(xt_ref, targ_ref, res_ref,
               w1t_ref, b1_ref, w2t_ref, b2_ref, w3t_ref, b3_ref,
               out_ref, acc_vars, acc_res):
        c = pl.program_id(0)                 # core chunk ("parallel")
        i = pl.program_id(1)                 # tile within chunk ("arbitrary")
        gi = c * tiles_per_core + i          # global tile index

        @pl.when(i == 0)
        def _init():
            acc_vars[...] = jnp.zeros_like(acc_vars)
            acc_res[...] = jnp.zeros_like(acc_res)

        col = jax.lax.broadcasted_iota(jnp.int32, (1, tile_n), 1) + gi * tile_n

        # ---- data-fit term: skip the whole tanh MLP on padding-only tiles ----
        @pl.when(gi * tile_n < n_pts)
        def _pts():
            h = jnp.tanh(jnp.dot(w1t_ref[...], xt_ref[...],
                                 preferred_element_type=jnp.float32) + b1_ref[...])
            h = jnp.tanh(jnp.dot(w2t_ref[...], h,
                                 preferred_element_type=jnp.float32) + b2_ref[...])
            pred = (jnp.dot(w3t_ref[...], h,
                            preferred_element_type=jnp.float32)
                    + b3_ref[...])                               # (D_OUT, tile_n)
            diff = jnp.where(col < n_pts, pred - targ_ref[...], 0.0)
            acc_vars[...] += diff * diff      # elementwise; reduce deferred

        # ---- residual term: independent guard (n_res may differ from n_pts) --
        @pl.when(gi * tile_n < n_res)
        def _res():
            r = jnp.where(col < n_res, res_ref[...], 0.0)
            acc_res[...] += r * r

        # ---- per-core finalize: one cross-lane reduce, one lane-dense store --
        @pl.when(i == tiles_per_core - 1)
        def _fin():
            sv = jnp.sum(acc_vars[...])
            sr = jnp.sum(acc_res[...])
            lane = jax.lax.broadcasted_iota(jnp.int32, (1, 1, 128), 2)
            out_ref[...] = jnp.where(lane == 0, sv,
                                     jnp.where(lane == 1, sr, 0.0))

    return kernel


# ----------------------------------------------------------------------------
# Jitted loss builder (CustomLoss.forward device part).
# ----------------------------------------------------------------------------
def make_loss_fn(hyper, output_dimension, training_ic=False):
    lam_res = 0.0 if training_ic else float(hyper["lambda_residual"])
    lam_reg = float(hyper["regularization_param"])
    p = int(hyper["kernel_regularizer"])
    del output_dimension  # D_OUT fixed by the network definition

    def lp_norm(w):                       # regularization(): torch.norm(W, p)
        if p == 2:
            return jnp.sqrt(jnp.sum(w * w))
        return jnp.sum(jnp.abs(w) ** p) ** (1.0 / p)

    @jax.jit
    def loss_fn(params, x_u_train, u_train, x_b_train, u_b_train,
                x_f_train, res_f):
        # TODO(synk): Ec.apply_BC is external; a Dirichlet BC (network
        # prediction at boundary points vs u_b_train) is assumed here.
        # TODO(synk): Ec.compute_res (RTE residual requiring input autodiff of
        # the network) is external; res_f is the precomputed residual on the
        # collocation points x_f_train.
        del x_f_train
        w1, b1, w2, b2, w3, b3 = params

        n_b, n_u = x_b_train.shape[0], x_u_train.shape[0]
        n_pts = n_b + n_u
        n_res = res_f.shape[0]
        n_vars = D_OUT * n_pts

        n_tiles = max(pl.cdiv(n_pts, TILE_N), pl.cdiv(n_res, TILE_N))
        tiles_per_core = pl.cdiv(n_tiles, NUM_CORES)
        n_pad = NUM_CORES * tiles_per_core * TILE_N

        f32 = jnp.float32
        # Lane-dense layout with minimal wrapper ops: one fused concat per
        # array (boundary + interior + zero pad); reshape(1,-1) is layout-free
        # for the (N,1) target and the residual vector.
        # NOTE: if the point sets are static across training steps this prep
        # can be hoisted out of the step entirely.
        xt = jnp.concatenate(
            [x_b_train.astype(f32).T, x_u_train.astype(f32).T,
             jnp.zeros((D_IN, n_pad - n_pts), f32)], axis=1)
        ut = jnp.concatenate(
            [u_b_train.astype(f32).reshape(1, -1),
             u_train.astype(f32).reshape(1, -1),
             jnp.zeros((1, n_pad - n_pts), f32)], axis=1)
        rt = jnp.concatenate(
            [res_f.astype(f32).reshape(1, -1),
             jnp.zeros((1, n_pad - n_res), f32)], axis=1)

        w1t, w2t, w3t = w1.T, w2.T, w3.T          # (H,D_IN), (H,H), (D_OUT,H)
        b1c, b2c, b3c = b1.reshape(-1, 1), b2.reshape(-1, 1), b3.reshape(-1, 1)

        kernel = _make_fused_kernel(n_pts, n_res, tiles_per_core, TILE_N)
        full = lambda shape: pl.BlockSpec(shape, lambda c, i: (0, 0))
        tiled = lambda rows: pl.BlockSpec(
            (rows, TILE_N), lambda c, i: (0, c * tiles_per_core + i))

        partials = pl.pallas_call(
            kernel,
            out_shape=jax.ShapeDtypeStruct((NUM_CORES, 1, 128), f32),
            grid=(NUM_CORES, tiles_per_core),
            in_specs=[
                tiled(D_IN),                 # x^T
                tiled(D_OUT),                # target^T
                tiled(1),                    # residual
                full((HIDDEN, D_IN)), full((HIDDEN, 1)),
                full((HIDDEN, HIDDEN)), full((HIDDEN, 1)),
                full((D_OUT, HIDDEN)), full((D_OUT, 1)),
            ],
            out_specs=pl.BlockSpec((1, 1, 128), lambda c, i: (c, 0, 0)),
            scratch_shapes=[pltpu.VMEM((D_OUT, TILE_N), f32),
                            pltpu.VMEM((1, TILE_N), f32)],
            compiler_params=pltpu.CompilerParams(
                dimension_semantics=("parallel", "arbitrary")),
        )(xt, ut, rt, w1t, b1c, w2t, b2c, w3t, b3c)

        # Tiny XLA epilogue: combine per-core partials, Lp weight norms, log10.
        sums = jnp.sum(partials, axis=(0, 1))          # (128,)
        loss_vars = sums[0] / float(n_vars)
        loss_res = sums[1] / float(n_res)
        loss_reg = lp_norm(w1) + lp_norm(w2) + lp_norm(w3)
        total = loss_vars + lam_res * loss_res + lam_reg * loss_reg
        return (jnp.log10(total), jnp.log10(loss_vars), jnp.log10(loss_res),
                loss_vars)

    return loss_fn


# ----------------------------------------------------------------------------
# Host-side forward (CustomLoss.forward): logging + NaN check after the step.
# ----------------------------------------------------------------------------
def custom_loss_forward(loss_fn, params, x_u_train, u_train, x_b_train,
                        u_b_train, x_f_train, res_f):
    loss_v, log_vars, log_res, loss_vars = jax.block_until_ready(
        loss_fn(params, x_u_train, u_train, x_b_train, u_b_train,
                x_f_train, res_f))
    # `assert not torch.isnan(u_pred_tot_vars).any()`: a NaN in any valid
    # prediction propagates into loss_vars, so this host check (after
    # block_until_ready) is equivalent and never stalls the device pipeline.
    assert not bool(np.isnan(np.asarray(loss_vars)))
    print('final loss:', np.round(np.asarray(loss_v), 4), ' ',
          np.round(np.asarray(log_vars), 4), ' ',
          np.round(np.asarray(log_res), 4))
    return loss_v


# ----------------------------------------------------------------------------
# Deterministic parameter / data setup.
# ----------------------------------------------------------------------------
def init_params(key):
    ks = jax.random.split(key, 6)

    def lin(kw, kb, fan_in, fan_out):
        bound = 1.0 / np.sqrt(fan_in)
        w = jax.random.uniform(kw, (fan_in, fan_out), jnp.float32, -bound, bound)
        b = jax.random.uniform(kb, (1, fan_out), jnp.float32, -bound, bound)
        return w, b

    w1, b1 = lin(ks[0], ks[1], D_IN, HIDDEN)
    w2, b2 = lin(ks[2], ks[3], HIDDEN, HIDDEN)
    w3, b3 = lin(ks[4], ks[5], HIDDEN, D_OUT)
    return (w1, b1, w2, b2, w3, b3)


if __name__ == "__main__":
    key = jax.random.PRNGKey(0)
    kp, kxu, ku, kxb, kub, kxf, kres = jax.random.split(key, 7)
    params = init_params(kp)

    Nu, Nb, Nf = 64, 32, 128
    x_u = jax.random.uniform(kxu, (Nu, D_IN), jnp.float32)     # interior data pts
    u_tr = jax.random.normal(ku, (Nu, D_OUT), jnp.float32)
    x_b = jax.random.uniform(kxb, (Nb, D_IN), jnp.float32)     # boundary pts
    u_b = jax.random.normal(kub, (Nb, D_OUT), jnp.float32)
    x_f = jax.random.uniform(kxf, (Nf, D_IN), jnp.float32)     # collocation pts
    res_f = 0.1 * jax.random.normal(kres, (Nf,), jnp.float32)  # stand-in for Ec.compute_res

    hyper = dict(lambda_residual=0.1,         # network.lambda_residual
                 regularization_param=1e-4,   # network.regularization_param
                 kernel_regularizer=2)        # network.kernel_regularizer (p)

    loss_fn = make_loss_fn(hyper, output_dimension=D_OUT, training_ic=False)
    loss_v = custom_loss_forward(loss_fn, params, x_u, u_tr, x_b, u_b, x_f, res_f)
    jax.block_until_ready(loss_v)
    assert not bool(jnp.isnan(loss_v))
    print("KERNEL_OK")
</pallas_src>

<mosaic_0001>
module attributes {stable_mosaic.version = 11 : i64} {
  func.func @kernel(%arg0: i32, %arg1: i32, %arg2: memref<4x2048xf32, #tpu.memory_space<vmem>>, %arg3: memref<1x2048xf32, #tpu.memory_space<vmem>>, %arg4: memref<1x2048xf32, #tpu.memory_space<vmem>>, %arg5: memref<32x4xf32, #tpu.memory_space<vmem>>, %arg6: memref<32x1xf32, #tpu.memory_space<vmem>>, %arg7: memref<32x32xf32, #tpu.memory_space<vmem>>, %arg8: memref<32x1xf32, #tpu.memory_space<vmem>>, %arg9: memref<1x32xf32, #tpu.memory_space<vmem>>, %arg10: memref<1x1xf32, #tpu.memory_space<vmem>>, %arg11: memref<1x1x128xf32, #tpu.memory_space<vmem>>, %arg12: memref<1x2048xf32, #tpu.memory_space<vmem>>, %arg13: memref<1x2048xf32, #tpu.memory_space<vmem>>) attributes {dimension_semantics = [#tpu.dimension_semantics<parallel>, #tpu.dimension_semantics<arbitrary>], iteration_bounds = array<i64: 2, 1>, scalar_prefetch = 0 : i64, scratch_operands = 2 : i64, tpu.core_type = #tpu.core_type<tc>, window_params = [{transform_indices = @transform_0, window_bounds = array<i64: 4, 2048>}, {transform_indices = @transform_1, window_bounds = array<i64: 1, 2048>}, {transform_indices = @transform_2, window_bounds = array<i64: 1, 2048>}, {pipeline_mode = #tpu.pipeline_mode<synchronous>, transform_indices = @transform_3, window_bounds = array<i64: 32, 4>}, {pipeline_mode = #tpu.pipeline_mode<synchronous>, transform_indices = @transform_4, window_bounds = array<i64: 32, 1>}, {pipeline_mode = #tpu.pipeline_mode<synchronous>, transform_indices = @transform_5, window_bounds = array<i64: 32, 32>}, {pipeline_mode = #tpu.pipeline_mode<synchronous>, transform_indices = @transform_6, window_bounds = array<i64: 32, 1>}, {pipeline_mode = #tpu.pipeline_mode<synchronous>, transform_indices = @transform_7, window_bounds = array<i64: 1, 32>}, {pipeline_mode = #tpu.pipeline_mode<synchronous>, transform_indices = @transform_8, window_bounds = array<i64: 1, 1>}, {transform_indices = @transform_9, window_bounds = array<i64: 1, 1, 128>}]} {
    %c1_i32 = arith.constant 1 : i32
    %0 = arith.muli %arg0, %c1_i32 : i32
    %1 = arith.addi %0, %arg1 : i32
    %c0_i32 = arith.constant 0 : i32
    %2 = arith.cmpi eq, %arg1, %c0_i32 : i32
    %3 = arith.extui %2 : i1 to i32
    %c0_i32_0 = arith.constant 0 : i32
    %4 = arith.cmpi ne, %3, %c0_i32_0 : i32
    scf.if %4 {
      %cst = arith.constant 0.000000e+00 : f32
      %20 = vector.broadcast %cst : f32 to vector<1x2048xf32>
      %c0 = arith.constant 0 : index
      %c0_7 = arith.constant 0 : index
      %21 = vector.load %arg12[%c0, %c0_7] : memref<1x2048xf32, #tpu.memory_space<vmem>>, vector<1x2048xf32>
      tpu.vector_store %arg12[%c0, %c0_7], %20 {strides = array<i32>} : memref<1x2048xf32, #tpu.memory_space<vmem>>, vector<1x2048xf32>,
      %cst_8 = arith.constant 0.000000e+00 : f32
      %22 = vector.broadcast %cst_8 : f32 to vector<1x2048xf32>
      %c0_9 = arith.constant 0 : index
      %c0_10 = arith.constant 0 : index
      %23 = vector.load %arg13[%c0_9, %c0_10] : memref<1x2048xf32, #tpu.memory_space<vmem>>, vector<1x2048xf32>
      tpu.vector_store %arg13[%c0_9, %c0_10], %22 {strides = array<i32>} : memref<1x2048xf32, #tpu.memory_space<vmem>>, vector<1x2048xf32>,
    } else {
    }
    %5 = tpu.iota {dimensions = array<i32: 1>} : vector<1x2048xi32>
    %c2048_i32 = arith.constant 2048 : i32
    %6 = arith.muli %1, %c2048_i32 : i32
    %7 = vector.broadcast %6 : i32 to vector<1x2048xi32>
    %8 = arith.addi %5, %7 : vector<1x2048xi32>
    %c2048_i32_1 = arith.constant 2048 : i32
    %9 = arith.muli %1, %c2048_i32_1 : i32
    %c96_i32 = arith.constant 96 : i32
    %10 = arith.cmpi slt, %9, %c96_i32 : i32
    %11 = arith.extui %10 : i1 to i32
    %c0_i32_2 = arith.constant 0 : i32
    %12 = arith.cmpi ne, %11, %c0_i32_2 : i32
    scf.if %12 {
      %c0 = arith.constant 0 : index
      %c0_7 = arith.constant 0 : index
      %20 = vector.load %arg5[%c0, %c0_7] : memref<32x4xf32, #tpu.memory_space<vmem>>, vector<32x4xf32>
      %c0_8 = arith.constant 0 : index
      %c0_9 = arith.constant 0 : index
      %21 = vector.load %arg2[%c0_8, %c0_9] : memref<4x2048xf32, #tpu.memory_space<vmem>>, vector<4x2048xf32>
      %cst = arith.constant dense<0.000000e+00> : vector<32x2048xf32>
      %22 = tpu.matmul %20, %21, %cst {dimension_numbers = #tpu.dot_dimension_numbers<[1], [0], [0], [1], [0, 0, 1, 1], [], []>} : vector<32x4xf32>, vector<4x2048xf32>, vector<32x2048xf32> -> vector<32x2048xf32>
      %c0_10 = arith.constant 0 : index
      %c0_11 = arith.constant 0 : index
      %23 = vector.load %arg6[%c0_10, %c0_11] : memref<32x1xf32, #tpu.memory_space<vmem>>, vector<32x1xf32>
      %24 = vector.broadcast %23 : vector<32x1xf32> to vector<32x2048xf32>
      %25 = arith.addf %22, %24 : vector<32x2048xf32>
      %26 = math.tanh %25 : vector<32x2048xf32>
      %c0_12 = arith.constant 0 : index
      %c0_13 = arith.constant 0 : index
      %27 = vector.load %arg7[%c0_12, %c0_13] : memref<32x32xf32, #tpu.memory_space<vmem>>, vector<32x32xf32>
      %cst_14 = arith.constant dense<0.000000e+00> : vector<32x2048xf32>
      %28 = tpu.matmul %27, %26, %cst_14 {dimension_numbers = #tpu.dot_dimension_numbers<[1], [0], [0], [1], [0, 0, 1, 1], [], []>} : vector<32x32xf32>, vector<32x2048xf32>, vector<32x2048xf32> -> vector<32x2048xf32>
      %c0_15 = arith.constant 0 : index
      %c0_16 = arith.constant 0 : index
      %29 = vector.load %arg8[%c0_15, %c0_16] : memref<32x1xf32, #tpu.memory_space<vmem>>, vector<32x1xf32>
      %30 = vector.broadcast %29 : vector<32x1xf32> to vector<32x2048xf32>
      %31 = arith.addf %28, %30 : vector<32x2048xf32>
      %32 = math.tanh %31 : vector<32x2048xf32>
      %c0_17 = arith.constant 0 : index
      %c0_18 = arith.constant 0 : index
      %33 = vector.load %arg9[%c0_17, %c0_18] : memref<1x32xf32, #tpu.memory_space<vmem>>, vector<1x32xf32>
      %cst_19 = arith.constant dense<0.000000e+00> : vector<1x2048xf32>
      %34 = tpu.matmul %33, %32, %cst_19 {dimension_numbers = #tpu.dot_dimension_numbers<[1], [0], [0], [1], [0, 0, 1, 1], [], []>} : vector<1x32xf32>, vector<32x2048xf32>, vector<1x2048xf32> -> vector<1x2048xf32>
      %c0_20 = arith.constant 0 : index
      %c0_21 = arith.constant 0 : index
      %35 = vector.load %arg10[%c0_20, %c0_21] : memref<1x1xf32, #tpu.memory_space<vmem>>, vector<1x1xf32>
      %36 = vector.broadcast %35 : vector<1x1xf32> to vector<1x2048xf32>
      %37 = arith.addf %34, %36 : vector<1x2048xf32>
      %c96_i32_22 = arith.constant 96 : i32
      %38 = vector.broadcast %c96_i32_22 : i32 to vector<1x2048xi32>
      %39 = arith.cmpi slt, %8, %38 : vector<1x2048xi32>
      %c0_23 = arith.constant 0 : index
      %c0_24 = arith.constant 0 : index
      %40 = vector.load %arg3[%c0_23, %c0_24] : memref<1x2048xf32, #tpu.memory_space<vmem>>, vector<1x2048xf32>
      %41 = arith.subf %37, %40 : vector<1x2048xf32>
      %cst_25 = arith.constant 0.000000e+00 : f32
      %42 = vector.broadcast %cst_25 : f32 to vector<1x2048xf32>
      %43 = arith.select %39, %41, %42 : vector<1x2048xi1>, vector<1x2048xf32>
      %c0_26 = arith.constant 0 : index
      %c0_27 = arith.constant 0 : index
      %44 = vector.load %arg12[%c0_26, %c0_27] : memref<1x2048xf32, #tpu.memory_space<vmem>>, vector<1x2048xf32>
      %45 = arith.mulf %43, %43 : vector<1x2048xf32>
      %46 = arith.addf %44, %45 : vector<1x2048xf32>
      %c0_28 = arith.constant 0 : index
      %c0_29 = arith.constant 0 : index
      %47 = vector.load %arg12[%c0_28, %c0_29] : memref<1x2048xf32, #tpu.memory_space<vmem>>, vector<1x2048xf32>
      tpu.vector_store %arg12[%c0_28, %c0_29], %46 {strides = array<i32>} : memref<1x2048xf32, #tpu.memory_space<vmem>>, vector<1x2048xf32>,
    } else {
    }
    %c2048_i32_3 = arith.constant 2048 : i32
    %13 = arith.muli %1, %c2048_i32_3 : i32
    %c128_i32 = arith.constant 128 : i32
    %14 = arith.cmpi slt, %13, %c128_i32 : i32
    %15 = arith.extui %14 : i1 to i32
    %c0_i32_4 = arith.constant 0 : i32
    %16 = arith.cmpi ne, %15, %c0_i32_4 : i32
    scf.if %16 {
      %c128_i32_7 = arith.constant 128 : i32
      %20 = vector.broadcast %c128_i32_7 : i32 to vector<1x2048xi32>
      %21 = arith.cmpi slt, %8, %20 : vector<1x2048xi32>
      %c0 = arith.constant 0 : index
      %c0_8 = arith.constant 0 : index
      %22 = vector.load %arg4[%c0, %c0_8] : memref<1x2048xf32, #tpu.memory_space<vmem>>, vector<1x2048xf32>
      %cst = arith.constant 0.000000e+00 : f32
      %23 = vector.broadcast %cst : f32 to vector<1x2048xf32>
      %24 = arith.select %21, %22, %23 : vector<1x2048xi1>, vector<1x2048xf32>
      %c0_9 = arith.constant 0 : index
      %c0_10 = arith.constant 0 : index
      %25 = vector.load %arg13[%c0_9, %c0_10] : memref<1x2048xf32, #tpu.memory_space<vmem>>, vector<1x2048xf32>
      %26 = arith.mulf %24, %24 : vector<1x2048xf32>
      %27 = arith.addf %25, %26 : vector<1x2048xf32>
      %c0_11 = arith.constant 0 : index
      %c0_12 = arith.constant 0 : index
      %28 = vector.load %arg13[%c0_11, %c0_12] : memref<1x2048xf32, #tpu.memory_space<vmem>>, vector<1x2048xf32>
      tpu.vector_store %arg13[%c0_11, %c0_12], %27 {strides = array<i32>} : memref<1x2048xf32, #tpu.memory_space<vmem>>, vector<1x2048xf32>,
    } else {
    }
    %c0_i32_5 = arith.constant 0 : i32
    %17 = arith.cmpi eq, %arg1, %c0_i32_5 : i32
    %18 = arith.extui %17 : i1 to i32
    %c0_i32_6 = arith.constant 0 : i32
    %19 = arith.cmpi ne, %18, %c0_i32_6 : i32
    scf.if %19 {
      %c0 = arith.constant 0 : index
      %c0_7 = arith.constant 0 : index
      %20 = vector.load %arg12[%c0, %c0_7] : memref<1x2048xf32, #tpu.memory_space<vmem>>, vector<1x2048xf32>
      %21 = vector.shape_cast %20 : vector<1x2048xf32> to vector<1x1x2048xf32>
      %cst = arith.constant dense<0.000000e+00> : vector<1xf32>
      %22 = vector.multi_reduction <add>, %21, %cst [1, 2] : vector<1x1x2048xf32> to vector<1xf32>
      %23 = vector.shape_cast %22 : vector<1xf32> to vector<1x1x1xf32>
      %24 = vector.extract %23[0, 0, 0] : f32 from vector<1x1x1xf32>
      %c0_8 = arith.constant 0 : index
      %c0_9 = arith.constant 0 : index
      %25 = vector.load %arg13[%c0_8, %c0_9] : memref<1x2048xf32, #tpu.memory_space<vmem>>, vector<1x2048xf32>
      %26 = vector.shape_cast %25 : vector<1x2048xf32> to vector<1x1x2048xf32>
      %cst_10 = arith.constant dense<0.000000e+00> : vector<1xf32>
      %27 = vector.multi_reduction <add>, %26, %cst_10 [1, 2] : vector<1x1x2048xf32> to vector<1xf32>
      %28 = vector.shape_cast %27 : vector<1xf32> to vector<1x1x1xf32>
      %29 = vector.extract %28[0, 0, 0] : f32 from vector<1x1x1xf32>
      %30 = tpu.iota {dimensions = array<i32: 2>} : vector<1x1x128xi32>
      %c0_i32_11 = arith.constant 0 : i32
      %31 = vector.broadcast %c0_i32_11 : i32 to vector<1x1x128xi32>
      %32 = arith.cmpi eq, %30, %31 : vector<1x1x128xi32>
      %c1_i32_12 = arith.constant 1 : i32
      %33 = vector.broadcast %c1_i32_12 : i32 to vector<1x1x128xi32>
      %34 = arith.cmpi eq, %30, %33 : vector<1x1x128xi32>
      %cst_13 = arith.constant 0.000000e+00 : f32
      %35 = vector.broadcast %29 : f32 to vector<1x1x128xf32>
      %36 = vector.broadcast %cst_13 : f32 to vector<1x1x128xf32>
      %37 = arith.select %34, %35, %36 : vector<1x1x128xi1>, vector<1x1x128xf32>
      %38 = vector.broadcast %24 : f32 to vector<1x1x128xf32>
      %39 = arith.select %32, %38, %37 : vector<1x1x128xi1>, vector<1x1x128xf32>
      %c0_14 = arith.constant 0 : index
      %c0_15 = arith.constant 0 : index
      %c0_16 = arith.constant 0 : index
      %40 = vector.load %arg11[%c0_14, %c0_15, %c0_16] : memref<1x1x128xf32, #tpu.memory_space<vmem>>, vector<1x1x128xf32>
      tpu.vector_store %arg11[%c0_14, %c0_15, %c0_16], %39 {strides = array<i32>} : memref<1x1x128xf32, #tpu.memory_space<vmem>>, vector<1x1x128xf32>,
    } else {
    }
    return
  }
  func.func @transform_0(%arg0: i32, %arg1: i32) -> (i32, i32) {
    %c1_i32 = arith.constant 1 : i32
    %0 = arith.muli %arg0, %c1_i32 : i32
    %1 = arith.addi %0, %arg1 : i32
    %c0_i32 = arith.constant 0 : i32
    %c0_i32_0 = arith.constant 0 : i32
    return %c0_i32, %1 : i32, i32
  }
  func.func @transform_1(%arg0: i32, %arg1: i32) -> (i32, i32) {
    %c1_i32 = arith.constant 1 : i32
    %0 = arith.muli %arg0, %c1_i32 : i32
    %1 = arith.addi %0, %arg1 : i32
    %c0_i32 = arith.constant 0 : i32
    %c0_i32_0 = arith.constant 0 : i32
    return %c0_i32, %1 : i32, i32
  }
  func.func @transform_2(%arg0: i32, %arg1: i32) -> (i32, i32) {
    %c1_i32 = arith.constant 1 : i32
    %0 = arith.muli %arg0, %c1_i32 : i32
    %1 = arith.addi %0, %arg1 : i32
    %c0_i32 = arith.constant 0 : i32
    %c0_i32_0 = arith.constant 0 : i32
    return %c0_i32, %1 : i32, i32
  }
  func.func @transform_3(%arg0: i32, %arg1: i32) -> (i32, i32) {
    %c0_i32 = arith.constant 0 : i32
    %c0_i32_0 = arith.constant 0 : i32
    %c0_i32_1 = arith.constant 0 : i32
    return %c0_i32, %c0_i32_0 : i32, i32
  }
  func.func @transform_4(%arg0: i32, %arg1: i32) -> (i32, i32) {
    %c0_i32 = arith.constant 0 : i32
    %c0_i32_0 = arith.constant 0 : i32
    %c0_i32_1 = arith.constant 0 : i32
    return %c0_i32, %c0_i32_0 : i32, i32
  }
  func.func @transform_5(%arg0: i32, %arg1: i32) -> (i32, i32) {
    %c0_i32 = arith.constant 0 : i32
    %c0_i32_0 = arith.constant 0 : i32
    %c0_i32_1 = arith.constant 0 : i32
    return %c0_i32, %c0_i32_0 : i32, i32
  }
  func.func @transform_6(%arg0: i32, %arg1: i32) -> (i32, i32) {
    %c0_i32 = arith.constant 0 : i32
    %c0_i32_0 = arith.constant 0 : i32
    %c0_i32_1 = arith.constant 0 : i32
    return %c0_i32, %c0_i32_0 : i32, i32
  }
  func.func @transform_7(%arg0: i32, %arg1: i32) -> (i32, i32) {
    %c0_i32 = arith.constant 0 : i32
    %c0_i32_0 = arith.constant 0 : i32
    %c0_i32_1 = arith.constant 0 : i32
    return %c0_i32, %c0_i32_0 : i32, i32
  }
  func.func @transform_8(%arg0: i32, %arg1: i32) -> (i32, i32) {
    %c0_i32 = arith.constant 0 : i32
    %c0_i32_0 = arith.constant 0 : i32
    %c0_i32_1 = arith.constant 0 : i32
    return %c0_i32, %c0_i32_0 : i32, i32
  }
  func.func @transform_9(%arg0: i32, %arg1: i32) -> (i32, i32, i32) {
    %c0_i32 = arith.constant 0 : i32
    %c0_i32_0 = arith.constant 0 : i32
    %c0_i32_1 = arith.constant 0 : i32
    return %arg0, %c0_i32, %c0_i32_0 : i32, i32, i32
  }
}

</mosaic_0001>

<bundles_post_ra>
// kernel: loss_fn.1
= control target key start
LH: loop header
LB: loop body
LE: loop exit
PB: predicated region body
PF: predicated region fallthrough
CT: control target
= control target key end

     0   :  { %s4196_s11 = smov 0   ;;  %s4198_s12 = smov 0   ;;  %s5029_s0 = inlined_call_operand.vmem [shape: f32[4,4096], index: 0, kind: input, shape index: {}]   ;;  %s5030_s1 = inlined_call_operand.vmem [shape: f32[1,4096], index: 1, kind: input, shape index: {}]   ;;  %s5031_s2 = inlined_call_operand.vmem [shape: f32[1,4096], index: 2, kind: input, shape index: {}]   ;;  %s5032_s3 = inlined_call_operand.vmem [shape: f32[32,4], index: 3, kind: input, shape index: {}]   ;;  %s5033_s4 = inlined_call_operand.vmem [shape: f32[32,1], index: 4, kind: input, shape index: {}]   ;;  %s5034_s5 = inlined_call_operand.vmem [shape: f32[32,32], index: 5, kind: input, shape index: {}]   ;;  %s5035_s6 = inlined_call_operand.vmem [shape: f32[32,1], index: 6, kind: input, shape index: {}]   ;;  %s5036_s7 = inlined_call_operand.vmem [shape: f32[1,32], index: 7, kind: input, shape index: {}]   ;;  %s5037_s8 = inlined_call_operand.<no memory space> [shape: f32[1,1], index: 8, kind: input, shape index: {}]   ;;  %s5038_s9 = inlined_call_operand.vmem [shape: f32[2,1,128], index: 9, kind: output, shape index: {}]  }
   0x1   :  { %v14_v0 = vstv %s5037_s8  ;;  %s4200_s13 = smov 0  }
   0x2   :  { %15 = vst [vmem:[#allocation4] sm:$0x1] %v14_v0 }
   0x3 LB: > { %s33_s8 = sadd.s32 1, %s4132_s12  ;;  %p3589_p0 = scmp.ge.s32.totalorder %s4136_s13, 1  ;;  %s4136_s13 = sphi %s4200_s13, %s21_s13   ;;  %s4132_s12 = sphi %s4198_s12, %s5040_s12   ;;  %s4128_s11 = sphi %s4196_s11, %s5039_s11  }
   0x4   : > { %p35_p1 = scmp.ge.s32.totalorder %s33_s8, 2  ;;  %p334_p2 = scmp.lt.s32.totalorder %s4136_s13, 3 }
   0x6   : > { %s5042_s8 = smov (%p35_p1, %s33_s8), 0  ;;  %p335_p3 = pnand %p3589_p0, %p334_p2 }
   0x7   : > { %s3590_s14 = sshll.u32 (!%p335_p3), %s4128_s11, 4  ;;  %p401_p4 = scmp.lt.s32.totalorder (!%p335_p3), %s4128_s11, 1  ;;  %v413_v1 = vlaneseq (!%p335_p3)  ;;  %v4138_v2 = vmov (!%p335_p3), 0.0  }
   0x8   : > { %338 = sbr.rel (%p335_p3) target bundleno = 1086 (0x43e), region = 56  ;;  %p381_p5 = scmp.lt.s32.totalorder (!%p335_p3), %s3590_s14, 31  ;;  %409 = vst [vmem:[#allocation2] sm:$0xff] (!%p335_p3), %v4138_v2  ;;  %410 = vst [vmem:[#allocation2 + $0x8] sm:$0xff] (!%p335_p3), %v4138_v2 }
   0x9   : > { %411 = vst [vmem:[#allocation3] sm:$0xff] (!%p335_p3), %v4138_v2  ;;  %412 = vst [vmem:[#allocation3 + $0x8] sm:$0xff] (!%p335_p3), %v4138_v2  ;;  %s4214_s15 = sshll.u32 (!%p335_p3), %s4128_s11, 11  ;;  %v4219_v3 = vand.u32 (!%p335_p3), 127, %v413_v1 }
   0xa   : > { %v431_v4 = vstv (!%p335_p3), %s4214_s15  ;;  %p3595_p6 = scmp.ge.s32.totalorder (!%p335_p3), %s4214_s15, 96 }
   0xb   : > { %v415_v5 = vadd.s32 (!%p335_p3), 128, %v4219_v3  ;;  %v416_v6 = vadd.s32 (!%p335_p3), 256, %v4219_v3  ;;  %v417_v7 = vadd.s32 (!%p335_p3), 384, %v4219_v3  ;;  %v418_v8 = vadd.s32 (!%p335_p3), 512, %v4219_v3 }
   0xc   : > { %v419_v9 = vadd.s32 (!%p335_p3), 640, %v4219_v3  ;;  %v420_v10 = vadd.s32 (!%p335_p3), 768, %v4219_v3  ;;  %v421_v11 = vadd.s32 (!%p335_p3), 896, %v4219_v3  ;;  %v422_v12 = vadd.s32 (!%p335_p3), 1024, %v4219_v3 }
   0xd   : > { %v423_v13 = vadd.s32 (!%p335_p3), 1152, %v4219_v3  ;;  %v424_v14 = vadd.s32 (!%p335_p3), 1280, %v4219_v3  ;;  %v425_v15 = vadd.s32 (!%p335_p3), 1408, %v4219_v3  ;;  %v426_v16 = vadd.s32 (!%p335_p3), 1536, %v4219_v3 }
   0xe   : > { %v427_v17 = vadd.s32 (!%p335_p3), 1664, %v4219_v3  ;;  %v428_v18 = vadd.s32 (!%p335_p3), 1792, %v4219_v3  ;;  %v429_v19 = vadd.s32 (!%p335_p3), 1920, %v4219_v3  ;;  %v4257_v20 = vadd.s32 (!%p335_p3), %v431_v4, %v4219_v3 }
   0xf   : > { %s5044_s11 = smov (!%p401_p4, %s4128_s11), 1  ;;  %s5046_s14 = smov (!%p381_p5, %s3590_s14), 31  ;;  %v4259_v21 = vadd.s32 %v431_v4, %v415_v5  ;;  %v4261_v22 = vadd.s32 %v431_v4, %v416_v6  ;;  %v4263_v23 = vadd.s32 %v431_v4, %v417_v7  ;;  %v4265_v24 = vadd.s32 %v431_v4, %v418_v8 }
  0x10   : > { %s403_s18 = scalar_lea.vmem %s5038_s9, %s5044_s11  ;;  %s3591_s19 = sshll.u32 %s5046_s14, 2  ;;  %v4267_v25 = vadd.s32 %v431_v4, %v419_v9  ;;  %v4269_v26 = vadd.s32 %v431_v4, %v420_v10  ;;  %v4271_v27 = vadd.s32 %v431_v4, %v421_v11  ;;  %v4273_v28 = vadd.s32 %v431_v4, %v422_v12  ;;  %v4299_v43 = vld [vmem:[%s5032_s3] sm:$0xff] (!%p3595_p6)  ;;  %v4316_v49 = vld [vmem:[%s5032_s3 + $0x8] sm:$0xff] (!%p3595_p6)  ;;  %v466_v53 = vld [vmem:[%s5033_s4 + $0x10] sm:$0xff] (!%p3595_p6) }
  0x11   : > { %s4233_s22 = scalar_lea.vmem %s5030_s1, %s5046_s14  ;;  %s4242_s25 = scalar_lea.vmem %s5029_s0, %s3591_s19  ;;  %v4275_v29 = vadd.s32 %v431_v4, %v423_v13  ;;  %v4277_v30 = vadd.s32 %v431_v4, %v424_v14  ;;  %v4279_v31 = vadd.s32 %v431_v4, %v425_v15  ;;  %v4281_v32 = vadd.s32 %v431_v4, %v426_v16  ;;  %v464_v52 = vld [vmem:[%s5033_s4] sm:$0xff] (!%p3595_p6)  ;;  %v4337_v54 = vld [vmem:[%s5032_s3 + $0x10] sm:$0xff] (!%p3595_p6)  ;;  %v465_v55 = vld [vmem:[%s5033_s4 + $0x8] sm:$0xff] (!%p3595_p6) }
  0x12   : > { %s4247_s28 = scalar_lea.vmem %s5031_s2, %s5046_s14  ;;  %v4283_v33 = vadd.s32 %v431_v4, %v427_v17  ;;  %v4285_v34 = vadd.s32 %v431_v4, %v428_v18  ;;  %v4287_v35 = vadd.s32 %v431_v4, %v429_v19  ;;  %451 = sbr.rel (%p3595_p6) target bundleno = 799 (0x31f), region = 64  ;;  %v456_v36 = vld [vmem:[%s4242_s25] sm:$0xff] (!%p3595_p6)  ;;  %vm517_vm0 = vcmask (!%p3595_p6), 1043456   ;;  %v457_v37 = vld [vmem:[%s4242_s25 + $0x8] sm:$0xff] (!%p3595_p6)  ;;  %v458_v41 = vld [vmem:[%s4242_s25 + $0x10] sm:$0xff] (!%p3595_p6) }
  0x13   : > { %v496_v38 = vcombine.high (!%p3595_p6), %v456_v36, %v456_v36  ;;  %v497_v39 = vcombine.high (!%p3595_p6), %v457_v37, %v457_v37  ;;  %v4139_v40 = vmov (!%p3595_p6), 0.0   ;;  %v459_v42 = vld [vmem:[%s4242_s25 + $0x18] sm:$0xff] (!%p3595_p6)  ;;  %vm504_vm1 = vcmask (!%p3595_p6), 31744   ;;  %v460_v47 = vld [vmem:[%s4242_s25 + $0x20] sm:$0xff] (!%p3595_p6)  ;;  %v461_v48 = vld [vmem:[%s4242_s25 + $0x28] sm:$0xff] (!%p3595_p6) }
  0x14   : > { %614 = vmatprep.mubr.f32.mxu0 (!%p3595_p6), %v4139_v40  ;;  %703 = vmatprep.mubr.f32.mxu1 (!%p3595_p6), %v4139_v40  ;;  %v4140_v44 = vmov (!%p3595_p6), 0   ;;  %v498_v45 = vcombine.high (!%p3595_p6), %v458_v41, %v458_v41  ;;  %v499_v46 = vcombine.high (!%p3595_p6), %v459_v42, %v459_v42  ;;  %v500_v50 = vcombine.high (!%p3595_p6), %v460_v47, %v460_v47  ;;  %v467_v56 = vld [vmem:[%s5033_s4 + $0x18] sm:$0xff] (!%p3595_p6)  ;;  %v462_v58 = vld [vmem:[%s4242_s25 + $0x30] sm:$0xff] (!%p3595_p6)  ;;  %v1330_v60 = vld [vmem:[%s5035_s6] sm:$0xff] (!%p3595_p6) }
  0x15   : > { %3848 = vset.pattern.permute.xlu0 (!%p3595_p6), %v4140_v44  ;;  %3849 = vset.pattern.permute.xlu1 (!%p3595_p6), %v4140_v44  ;;  %v501_v51 = vcombine.high (!%p3595_p6), %v461_v48, %v461_v48  ;;  %v4356_v57 = vld [vmem:[%s5032_s3 + $0x18] sm:$0xff] (!%p3595_p6)  ;;  %v1331_v61 = vld [vmem:[%s5035_s6 + $0x8] sm:$0xff] (!%p3595_p6)  ;;  %v502_v62 = vcombine.high (!%p3595_p6), %v462_v58, %v462_v58  ;;  %v1332_v0 = vld [vmem:[%s5035_s6 + $0x10] sm:$0xff] (!%p3595_p6)  ;;  %vm1354_vm2 = vcmask (!%p3595_p6), 261120   ;;  %vm2725_vm3 = vcmp.lt.s32.totalorder (!%p3595_p6), %v4257_v20, 96 }
  0x16   : > { %3596 = vmatprep.subr.msk.mxu0 (!%p3595_p6), %vm517_vm0, %v496_v38  ;;  %3602 = vmatprep.subr.msk.mxu1 (!%p3595_p6), %vm517_vm0, %v497_v39  ;;  %v463_v59 = vld [vmem:[%s4242_s25 + $0x38] sm:$0xff] (!%p3595_p6)  ;;  %v2144_v4 = vld [vmem:[#allocation4] sm:$0x1] (!%p3595_p6)  ;;  %vm2727_vm4 = vcmp.lt.s32.totalorder (!%p3595_p6), %v4261_v22, 96  ;;  %vm2726_vm5 = vcmp.lt.s32.totalorder (!%p3595_p6), %v4259_v21, 96  ;;  %vm2728_vm6 = vcmp.lt.s32.totalorder (!%p3595_p6), %v4263_v23, 96 }
  0x17   : > { %3597 = vmatpush1.msk.msra.mxu0 (!%p3595_p6), %vm517_vm0, %v456_v36  ;;  %3603 = vmatpush1.msk.msra.mxu1 (!%p3595_p6), %vm517_vm0, %v457_v37  ;;  %v503_v63 = vcombine.high (!%p3595_p6), %v463_v59, %v463_v59  ;;  %v1333_v2 = vld [vmem:[%s5035_s6 + $0x18] sm:$0xff] (!%p3595_p6)  ;;  %vm2729_vm7 = vcmp.lt.s32.totalorder (!%p3595_p6), %v4265_v24, 96  ;;  %vm2731_vm8 = vcmp.lt.s32.totalorder (!%p3595_p6), %v4269_v26, 96  ;;  %vm2730_vm9 = vcmp.lt.s32.totalorder (!%p3595_p6), %v4267_v25, 96 }
  0x18   : > { %3598 = vmatmul.mubr.msk.f32.vlgmr.msra.gmra.mrb[0].mxu0 (!%p3595_p6), %vm504_vm1, %v4299_v43  ;;  %3604 = vmatmul.mubr.msk.f32.vlgmr.msra.gmra.mrb[0].mxu1 (!%p3595_p6), %vm504_vm1, %v4299_v43  ;;  %vm2732_vm10 = vcmp.lt.s32.totalorder (!%p3595_p6), %v4271_v27, 96  ;;  %vm2733_vm11 = vcmp.lt.s32.totalorder (!%p3595_p6), %v4273_v28, 96  ;;  %vm2735_vm12 = vcmp.lt.s32.totalorder (!%p3595_p6), %v4277_v30, 96  ;;  %vm2734_vm13 = vcmp.lt.s32.totalorder (!%p3595_p6), %v4275_v29, 96 }
  0x19   : > { %620 = vmatprep.mubr.f32.mxu0 %v4139_v40  ;;  %709 = vmatprep.mubr.f32.mxu1 %v4139_v40  ;;  %vm2736_vm14 = vcmp.lt.s32.totalorder %v4279_v31, 96  ;;  %vm2737_vm15 = vcmp.lt.s32.totalorder %v4281_v32, 96 }
  0x1a   : > { %3608 = vmatprep.subr.msk.mxu0 %vm517_vm0, %v498_v45  ;;  %3614 = vmatprep.subr.msk.mxu1 %vm517_vm0, %v499_v46 }
  0x1b   : > { %3609 = vmatpush1.msk.msra.mxu0 %vm517_vm0, %v458_v41  ;;  %3615 = vmatpush1.msk.msra.mxu1 %vm517_vm0, %v459_v42 }
  0x1c   : > { %3599 = vmatmul.mubr.msk.f32.gmra.mrb[2].mxu0 %vm504_vm1, %v4316_v49  ;;  %3605 = vmatmul.mubr.msk.f32.gmra.mrb[2].mxu1 %vm504_vm1, %v4316_v49 }
  0x1d   : > { %626 = vmatprep.mubr.f32.mxu0 %v4139_v40  ;;  %715 = vmatprep.mubr.f32.mxu1 %v4139_v40 }
  0x1e   : > { %3620 = vmatprep.subr.msk.mxu0 %vm517_vm0, %v500_v50  ;;  %3626 = vmatprep.subr.msk.mxu1 %vm517_vm0, %v501_v51 }
  0x1f   : > { %470 = vperm.xlu0 %3848, %v464_v52   ;;  %480 = vperm.xlu1 %3849, %v466_v53  }
  0x20   : > { %3600 = vmatmul.mubr.msk.f32.gmra.mrb[4].mxu0 %vm504_vm1, %v4337_v54  ;;  %3606 = vmatmul.mubr.msk.f32.gmra.mrb[4].mxu1 %vm504_vm1, %v4337_v54 }
  0x21   : > { %632 = vmatprep.mubr.f32.mxu0 %v4139_v40  ;;  %721 = vmatprep.mubr.f32.mxu1 %v4139_v40 }
  0x23   : > { %475 = vperm.xlu0 %3848, %v465_v55   ;;  %485 = vperm.xlu1 %3849, %v467_v56  }
  0x24   : > { %3601 = vmatmul.mubr.msk.f32.gmra.mrb[6].mxu0 %vm504_vm1, %v4356_v57  ;;  %3607 = vmatmul.mubr.msk.f32.gmra.mrb[6].mxu1 %vm504_vm1, %v4356_v57 }
  0x25   : > { %792 = vmatprep.mubr.f32.mxu0 %v4139_v40  ;;  %881 = vmatprep.mubr.f32.mxu1 %v4139_v40 }
  0x27   : > { %1336 = vperm.xlu0 %3848, %v1330_v60   ;;  %1341 = vperm.xlu1 %3849, %v1331_v61  }
  0x28   : > { %3610 = vmatmul.mubr.msk.f32.vlgmr.msra.gmra.mrb[8].mxu0 %vm504_vm1, %v4299_v43  ;;  %3616 = vmatmul.mubr.msk.f32.vlgmr.msra.gmra.mrb[8].mxu1 %vm504_vm1, %v4299_v43 }
  0x29   : > { %798 = vmatprep.mubr.f32.mxu0 %v4139_v40  ;;  %887 = vmatprep.mubr.f32.mxu1 %v4139_v40 }
  0x2a   : > { %3621 = vmatpush1.msk.msra.mxu0 %vm517_vm0, %v460_v47  ;;  %3627 = vmatpush1.msk.msra.mxu1 %vm517_vm0, %v461_v48 }
  0x2b   : > { %3632 = vmatprep.subr.msk.mxu0 %vm517_vm0, %v502_v62  ;;  %3638 = vmatprep.subr.msk.mxu1 %vm517_vm0, %v503_v63 }
  0x2c   : > { %3611 = vmatmul.mubr.msk.f32.gmra.mrb[10].mxu0 %vm504_vm1, %v4316_v49  ;;  %3617 = vmatmul.mubr.msk.f32.gmra.mrb[10].mxu1 %vm504_vm1, %v4316_v49 }
  0x2d   : > { %804 = vmatprep.mubr.f32.mxu0 %v4139_v40  ;;  %893 = vmatprep.mubr.f32.mxu1 %v4139_v40 }
  0x2e   : > { %1346 = vperm.xlu0 %3848, %v1332_v0   ;;  %1351 = vperm.xlu1 %3849, %v1333_v2  }
  0x30   : > { %3612 = vmatmul.mubr.msk.f32.gmra.mrb[12].mxu0 %vm504_vm1, %v4337_v54  ;;  %3618 = vmatmul.mubr.msk.f32.gmra.mrb[12].mxu1 %vm504_vm1, %v4337_v54 }
  0x31   : > { %810 = vmatprep.mubr.f32.mxu0 %v4139_v40  ;;  %899 = vmatprep.mubr.f32.mxu1 %v4139_v40 }
  0x32   : > { %2147 = vperm.xlu0 %3848, %v2144_v4  }
  0x34   : > { %3613 = vmatmul.mubr.msk.f32.gmra.mrb[14].mxu0 %vm504_vm1, %v4356_v57  ;;  %3619 = vmatmul.mubr.msk.f32.gmra.mrb[14].mxu1 %vm504_vm1, %v4356_v57 }
  0x35   : > { %970 = vmatprep.mubr.f32.mxu0 %v4139_v40  ;;  %1059 = vmatprep.mubr.f32.mxu1 %v4139_v40 }
  0x38   : > { %3622 = vmatmul.mubr.msk.f32.vlgmr.msra.gmra.mrb[16].mxu0 %vm504_vm1, %v4299_v43  ;;  %3628 = vmatmul.mubr.msk.f32.vlgmr.msra.gmra.mrb[16].mxu1 %vm504_vm1, %v4299_v43 }
  0x39   : > { %976 = vmatprep.mubr.f32.mxu0 %v4139_v40  ;;  %1065 = vmatprep.mubr.f32.mxu1 %v4139_v40 }
  0x3a   : > { %3633 = vmatpush1.msk.msra.mxu0 %vm517_vm0, %v462_v58  ;;  %3639 = vmatpush1.msk.msra.mxu1 %vm517_vm0, %v463_v59  ;;  %vm2739_vm0 = vcmp.lt.s32.totalorder %v4285_v34, 96 }
  0x3c   : > { %3623 = vmatmul.mubr.msk.f32.gmra.mrb[18].mxu0 %vm504_vm1, %v4316_v49  ;;  %3629 = vmatmul.mubr.msk.f32.gmra.mrb[18].mxu1 %vm504_vm1, %v4316_v49 }
  0x3d   : > { %982 = vmatprep.mubr.f32.mxu0 %v4139_v40  ;;  %1071 = vmatprep.mubr.f32.mxu1 %v4139_v40 }
  0x40   : > { %3624 = vmatmul.mubr.msk.f32.gmra.mrb[20].mxu0 %vm504_vm1, %v4337_v54  ;;  %3630 = vmatmul.mubr.msk.f32.gmra.mrb[20].mxu1 %vm504_vm1, %v4337_v54 }
  0x41   : > { %988 = vmatprep.mubr.f32.mxu0 %v4139_v40  ;;  %1077 = vmatprep.mubr.f32.mxu1 %v4139_v40 }
  0x44   : > { %3625 = vmatmul.mubr.msk.f32.gmra.mrb[22].mxu0 %vm504_vm1, %v4356_v57  ;;  %3631 = vmatmul.mubr.msk.f32.gmra.mrb[22].mxu1 %vm504_vm1, %v4356_v57 }
  0x45   : > { %1148 = vmatprep.mubr.f32.mxu0 %v4139_v40  ;;  %1237 = vmatprep.mubr.f32.mxu1 %v4139_v40 }
  0x48   : > { %3634 = vmatmul.mubr.msk.f32.vlgmr.msra.gmra.mrb[24].mxu0 %vm504_vm1, %v4299_v43  ;;  %3640 = vmatmul.mubr.msk.f32.vlgmr.msra.gmra.mrb[24].mxu1 %vm504_vm1, %v4299_v43 }
  0x49   : > { %1154 = vmatprep.mubr.f32.mxu0 %v4139_v40  ;;  %1243 = vmatprep.mubr.f32.mxu1 %v4139_v40 }
  0x4c   : > { %3635 = vmatmul.mubr.msk.f32.gmra.mrb[26].mxu0 %vm504_vm1, %v4316_v49  ;;  %3641 = vmatmul.mubr.msk.f32.gmra.mrb[26].mxu1 %vm504_vm1, %v4316_v49 }
  0x4d   : > { %1160 = vmatprep.mubr.f32.mxu0 %v4139_v40  ;;  %1249 = vmatprep.mubr.f32.mxu1 %v4139_v40 }
  0x50   : > { %3636 = vmatmul.mubr.msk.f32.gmra.mrb[28].mxu0 %vm504_vm1, %v4337_v54  ;;  %3642 = vmatmul.mubr.msk.f32.gmra.mrb[28].mxu1 %vm504_vm1, %v4337_v54 }
  0x51   : > { %1166 = vmatprep.mubr.f32.mxu0 %v4139_v40  ;;  %1255 = vmatprep.mubr.f32.mxu1 %v4139_v40 }
  0x54   : > { %3637 = vmatmul.mubr.msk.f32.gmra.mrb[30].mxu0 %vm504_vm1, %v4356_v57  ;;  %3643 = vmatmul.mubr.msk.f32.gmra.mrb[30].mxu1 %vm504_vm1, %v4356_v57  ;;  %vm2738_vm1 = vcmp.lt.s32.totalorder %v4283_v33, 96 }
  0x55   : > { %1431 = vmatprep.mubr.f32.mxu0 %v4139_v40  ;;  %1520 = vmatprep.mubr.f32.mxu1 %v4139_v40 }
  0x9e   : > { %v4456_v5 = vpop.permute.xlu0 %470  ;;  %v4464_v15 = vpop.permute.xlu1 %480 }
  0xa2   : > { %v4462_v14 = vpop.permute.xlu0 %475  ;;  %v4474_v49 = vpop.permute.xlu1 %485 }
  0xeb   : > { %v616_v6 = vpop.f32.mrb[0].mxu0  ;;  %v705_v7 = vpop.f32.mrb[0].mxu1 }
  0xec   : > { %v617_v8 = vadd.f32 %v616_v6, %v4456_v5  ;;  %v706_v9 = vadd.f32 %v705_v7, %v4456_v5  ;;  %v618_v10 = vpop.f32.mrb[1].mxu0  ;;  %v707_v11 = vpop.f32.mrb[1].mxu1 }
  0xed   : > { %v619_v12 = vadd.f32 %v618_v10, %v4456_v5  ;;  %v708_v13 = vadd.f32 %v707_v11, %v4456_v5 }
  0xee   : > { %3858 = vtanh.f32 %v617_v8 }
  0xef   : > { %3860 = vtanh.f32 %v706_v9  ;;  %v622_v16 = vpop.f32.mrb[2].mxu0  ;;  %v711_v17 = vpop.f32.mrb[2].mxu1 }
  0xf0   : > { %3862 = vtanh.f32 %v619_v12  ;;  %v623_v18 = vadd.f32 %v622_v16, %v4462_v14  ;;  %v712_v19 = vadd.f32 %v711_v17, %v4462_v14  ;;  %v624_v36 = vpop.f32.mrb[3].mxu0  ;;  %v713_v37 = vpop.f32.mrb[3].mxu1 }
  0xf1   : > { %3864 = vtanh.f32 %v708_v13  ;;  %v625_v38 = vadd.f32 %v624_v36, %v4462_v14  ;;  %v714_v39 = vadd.f32 %v713_v37, %v4462_v14 }
  0xf2   : > { %3866 = vtanh.f32 %v623_v18 }
  0xf3   : > { %3868 = vtanh.f32 %v712_v19  ;;  %v628_v41 = vpop.f32.mrb[4].mxu0  ;;  %v717_v42 = vpop.f32.mrb[4].mxu1 }
  0xf4   : > { %3870 = vtanh.f32 %v625_v38  ;;  %v629_v43 = vadd.f32 %v628_v41, %v4464_v15  ;;  %v718_v44 = vadd.f32 %v717_v42, %v4464_v15  ;;  %v630_v45 = vpop.f32.mrb[5].mxu0  ;;  %v719_v46 = vpop.f32.mrb[5].mxu1 }
  0xf5   : > { %3872 = vtanh.f32 %v714_v39  ;;  %v631_v47 = vadd.f32 %v630_v45, %v4464_v15  ;;  %v720_v48 = vadd.f32 %v719_v46, %v4464_v15 }
  0xf6   : > { %3874 = vtanh.f32 %v629_v43 }
  0xf7   : > { %3876 = vtanh.f32 %v718_v44  ;;  %v634_v50 = vpop.f32.mrb[6].mxu0  ;;  %v723_v51 = vpop.f32.mrb[6].mxu1 }
  0xf8   : > { %v3859_v52 = vpop.eup %3858  ;;  %3878 = vtanh.f32 %v631_v47  ;;  %v635_v53 = vadd.f32 %v634_v50, %v4474_v49  ;;  %v724_v54 = vadd.f32 %v723_v51, %v4474_v49  ;;  %v636_v55 = vpop.f32.mrb[7].mxu0 }
  0xf9   : > { %v725_v56 = vpop.f32.mrb[7].mxu1  ;;  %v3861_v57 = vpop.eup %3860  ;;  %3880 = vtanh.f32 %v720_v48  ;;  %v637_v58 = vadd.f32 %v636_v55, %v4474_v49 }
  0xfa   : > { %v726_v59 = vadd.f32 %v725_v56, %v4474_v49  ;;  %v3863_v60 = vpop.eup %3862  ;;  %3882 = vtanh.f32 %v635_v53 }
  0xfb   : > { %v3865_v61 = vpop.eup %3864  ;;  %3884 = vtanh.f32 %v724_v54  ;;  %v794_v62 = vpop.f32.mrb[8].mxu0 }
  0xfc   : > { %v883_v63 = vpop.f32.mrb[8].mxu1  ;;  %v3867_v0 = vpop.eup %3866  ;;  %3886 = vtanh.f32 %v637_v58  ;;  %v795_v2 = vadd.f32 %v794_v62, %v4456_v5 }
  0xfd   : > { %v884_v4 = vadd.f32 %v883_v63, %v4456_v5  ;;  %v796_v6 = vpop.f32.mrb[9].mxu0  ;;  %v885_v7 = vpop.f32.mrb[9].mxu1  ;;  %3888 = vtanh.f32 %v726_v59  ;;  %v3689_v11 = vpack.c.bf16 %v3867_v0, %v3859_v52 }
  0xfe   : > { %v3869_v8 = vpop.eup %3868  ;;  %v797_v9 = vadd.f32 %v796_v6, %v4456_v5  ;;  %v886_v10 = vadd.f32 %v885_v7, %v4456_v5  ;;  %3890 = vtanh.f32 %v795_v2 }
  0xff   : > { %v3871_v12 = vpop.eup %3870  ;;  %v3697_v13 = vpack.c.bf16 %v3869_v8, %v3861_v57  ;;  %3892 = vtanh.f32 %v884_v4  ;;  %v800_v17 = vpop.f32.mrb[10].mxu0 }
 0x100   : > { %v3873_v16 = vpop.eup %3872  ;;  %v889_v18 = vpop.f32.mrb[10].mxu1  ;;  %v3687_v19 = vpack.c.bf16 %v3871_v12, %v3863_v60  ;;  %3894 = vtanh.f32 %v797_v9  ;;  %v801_v37 = vadd.f32 %v800_v17, %v4462_v14  ;;  %v4501_v17 = vld [vmem:[%s5034_s5] sm:$0xff] }
 0x101   : > { %v3875_v36 = vpop.eup %3874  ;;  %v890_v38 = vadd.f32 %v889_v18, %v4462_v14  ;;  %v802_v39 = vpop.f32.mrb[11].mxu0  ;;  %v3695_v42 = vpack.c.bf16 %v3873_v16, %v3865_v61  ;;  %3896 = vtanh.f32 %v886_v10 }
 0x102   : > { %v891_v41 = vpop.f32.mrb[11].mxu1  ;;  %v3877_v43 = vpop.eup %3876  ;;  %v803_v44 = vadd.f32 %v802_v39, %v4462_v14  ;;  %3688 = vmatprep.subr.bf16.mxu0 %v3687_v19  ;;  %3898 = vtanh.f32 %v801_v37 }
 0x103   : > { %v892_v45 = vadd.f32 %v891_v41, %v4462_v14  ;;  %v3879_v46 = vpop.eup %3878  ;;  %3696 = vmatprep.subr.bf16.mxu1 %v3695_v42  ;;  %3690 = vmatpush1.bf16.msra.mxu0 %v3689_v11  ;;  %3900 = vtanh.f32 %v890_v38  ;;  %v806_v48 = vpop.f32.mrb[12].mxu0 }
 0x104   : > { %v3881_v47 = vpop.eup %3880  ;;  %3698 = vmatpush1.bf16.msra.mxu1 %v3697_v13  ;;  %v895_v50 = vpop.f32.mrb[12].mxu1  ;;  %3902 = vtanh.f32 %v803_v44  ;;  %v807_v52 = vadd.f32 %v806_v48, %v4464_v15  ;;  %v4516_v48 = vld [vmem:[%s5034_s5 + $0x8] sm:$0xff] }
 0x105   : > { %v3883_v51 = vpop.eup %3882  ;;  %v896_v53 = vadd.f32 %v895_v50, %v4464_v15  ;;  %v808_v54 = vpop.f32.mrb[13].mxu0  ;;  %3904 = vtanh.f32 %v892_v45 }
 0x106   : > { %v897_v55 = vpop.f32.mrb[13].mxu1  ;;  %v3885_v56 = vpop.eup %3884  ;;  %v809_v57 = vadd.f32 %v808_v54, %v4464_v15  ;;  %v3693_v59 = vpack.c.bf16 %v3883_v51, %v3875_v36  ;;  %3906 = vtanh.f32 %v807_v52 }
 0x107   : > { %v898_v58 = vadd.f32 %v897_v55, %v4464_v15  ;;  %v3887_v60 = vpop.eup %3886  ;;  %v3701_v61 = vpack.c.bf16 %v3885_v56, %v3877_v43  ;;  %3908 = vtanh.f32 %v896_v53  ;;  %v812_v63 = vpop.f32.mrb[14].mxu0 }
 0x108   : > { %v3889_v62 = vpop.eup %3888  ;;  %v901_v0 = vpop.f32.mrb[14].mxu1  ;;  %v3691_v2 = vpack.c.bf16 %v3887_v60, %v3879_v46  ;;  %3910 = vtanh.f32 %v809_v57  ;;  %v813_v6 = vadd.f32 %v812_v63, %v4474_v49 }
 0x109   : > { %v4492_v4 = vpop.eup %3890  ;;  %v902_v7 = vadd.f32 %v901_v0, %v4474_v49  ;;  %v814_v8 = vpop.f32.mrb[15].mxu0  ;;  %v3699_v10 = vpack.c.bf16 %v3889_v62, %v3881_v47  ;;  %3912 = vtanh.f32 %v898_v58 }
 0x10a   : > { %v903_v9 = vpop.f32.mrb[15].mxu1  ;;  %v3893_v11 = vpop.eup %3892  ;;  %v815_v12 = vadd.f32 %v814_v8, %v4474_v49  ;;  %3692 = vmatprep.subr.bf16.mxu0 %v3691_v2  ;;  %3914 = vtanh.f32 %v813_v6  ;;  %v4534_v2 = vld [vmem:[%s5034_s5 + $0x10] sm:$0xff] }
 0x10b   : > { %v904_v13 = vadd.f32 %v903_v9, %v4474_v49  ;;  %v3895_v16 = vpop.eup %3894  ;;  %3700 = vmatprep.subr.bf16.mxu1 %v3699_v10  ;;  %3694 = vmatpush1.bf16.msra.mxu0 %v3693_v59  ;;  %3916 = vtanh.f32 %v902_v7  ;;  %v972_v19 = vpop.f32.mrb[16].mxu0 }
 0x10c   : > { %v3897_v18 = vpop.eup %3896  ;;  %3702 = vmatpush1.bf16.msra.mxu1 %v3701_v61  ;;  %v1061_v36 = vpop.f32.mrb[16].mxu1  ;;  %3918 = vtanh.f32 %v815_v12  ;;  %v973_v38 = vadd.f32 %v972_v19, %v4456_v5 }
 0x10d   : > { %v3899_v37 = vpop.eup %3898  ;;  %v1062_v39 = vadd.f32 %v1061_v36, %v4456_v5  ;;  %v974_v41 = vpop.f32.mrb[17].mxu0  ;;  %3920 = vtanh.f32 %v904_v13 }
 0x10e   : > { %v1063_v42 = vpop.f32.mrb[17].mxu1  ;;  %v3901_v43 = vpop.eup %3900  ;;  %v975_v44 = vadd.f32 %v974_v41, %v4456_v5  ;;  %3644 = vmatmul.mubr.msk.f32.vlgmr.msra.gmra.mrb[32].mxu0 %vm1354_vm2, %v4501_v17  ;;  %v3705_v46 = vpack.c.bf16 %v3899_v37, %v4492_v4  ;;  %3922 = vtanh.f32 %v973_v38  ;;  %v4551_v37 = vld [vmem:[%s5034_s5 + $0x18] sm:$0xff] }
 0x10f   : > { %v1064_v45 = vadd.f32 %v1063_v42, %v4456_v5  ;;  %v3903_v47 = vpop.eup %3902  ;;  %3648 = vmatmul.mubr.msk.f32.vlgmr.msra.gmra.mrb[32].mxu1 %vm1354_vm2, %v4501_v17  ;;  %1437 = vmatprep.mubr.f32.mxu0 %v4139_v40  ;;  %v3713_v50 = vpack.c.bf16 %v3901_v43, %v3893_v11  ;;  %3924 = vtanh.f32 %v1062_v39  ;;  %v978_v52 = vpop.f32.mrb[18].mxu0 }
 0x110   : > { %v3905_v51 = vpop.eup %3904  ;;  %v1067_v53 = vpop.f32.mrb[18].mxu1  ;;  %1526 = vmatprep.mubr.f32.mxu1 %v4139_v40  ;;  %v3703_v54 = vpack.c.bf16 %v3903_v47, %v3895_v16  ;;  %3926 = vtanh.f32 %v975_v44  ;;  %v979_v56 = vadd.f32 %v978_v52, %v4462_v14 }
 0x111   : > { %v4519_v55 = vpop.eup %3906  ;;  %v1068_v57 = vadd.f32 %v1067_v53, %v4462_v14  ;;  %v980_v58 = vpop.f32.mrb[19].mxu0  ;;  %v3711_v60 = vpack.c.bf16 %v3905_v51, %v3897_v18  ;;  %3928 = vtanh.f32 %v1064_v45 }
 0x112   : > { %v1069_v59 = vpop.f32.mrb[19].mxu1  ;;  %v4523_v61 = vpop.eup %3908  ;;  %v981_v62 = vadd.f32 %v980_v58, %v4462_v14  ;;  %3645 = vmatmul.mubr.msk.f32.gmra.mrb[34].mxu0 %vm1354_vm2, %v4516_v48  ;;  %3704 = vmatprep.subr.bf16.mxu0 %v3703_v54  ;;  %3930 = vtanh.f32 %v979_v56 }
 0x113   : > { %v1070_v63 = vadd.f32 %v1069_v59, %v4462_v14  ;;  %v3911_v0 = vpop.eup %3910  ;;  %3649 = vmatmul.mubr.msk.f32.gmra.mrb[34].mxu1 %vm1354_vm2, %v4516_v48  ;;  %3712 = vmatprep.subr.bf16.mxu1 %v3711_v60  ;;  %3932 = vtanh.f32 %v1068_v57  ;;  %v984_v6 = vpop.f32.mrb[20].mxu0 }
 0x114   : > { %v3913_v4 = vpop.eup %3912  ;;  %3706 = vmatpush1.bf16.msra.mxu0 %v3705_v46  ;;  %3714 = vmatpush1.bf16.msra.mxu1 %v3713_v50  ;;  %v1073_v7 = vpop.f32.mrb[20].mxu1  ;;  %3934 = vtanh.f32 %v981_v62  ;;  %v985_v9 = vadd.f32 %v984_v6, %v4464_v15 }
 0x115   : > { %v3915_v8 = vpop.eup %3914  ;;  %v1074_v10 = vadd.f32 %v1073_v7, %v4464_v15  ;;  %1443 = vmatprep.mubr.f32.mxu0 %v4139_v40  ;;  %1532 = vmatprep.mubr.f32.mxu1 %v4139_v40  ;;  %v986_v11 = vpop.f32.mrb[21].mxu0  ;;  %3936 = vtanh.f32 %v1070_v63 }
 0x116   : > { %v1075_v12 = vpop.f32.mrb[21].mxu1  ;;  %v3917_v13 = vpop.eup %3916  ;;  %v987_v16 = vadd.f32 %v986_v11, %v4464_v15  ;;  %3646 = vmatmul.mubr.msk.f32.gmra.mrb[36].mxu0 %vm1354_vm2, %v4534_v2  ;;  %v3709_v19 = vpack.c.bf16 %v3915_v8, %v4519_v55  ;;  %3938 = vtanh.f32 %v985_v9 }
 0x117   : > { %v1076_v18 = vadd.f32 %v1075_v12, %v4464_v15  ;;  %v3919_v36 = vpop.eup %3918  ;;  %3650 = vmatmul.mubr.msk.f32.gmra.mrb[36].mxu1 %vm1354_vm2, %v4534_v2  ;;  %1449 = vmatprep.mubr.f32.mxu0 %v4139_v40  ;;  %v3717_v38 = vpack.c.bf16 %v3917_v13, %v4523_v61  ;;  %3940 = vtanh.f32 %v1074_v10  ;;  %v990_v41 = vpop.f32.mrb[22].mxu0 }
 0x118   : > { %v3921_v39 = vpop.eup %3920  ;;  %v1079_v42 = vpop.f32.mrb[22].mxu1  ;;  %1538 = vmatprep.mubr.f32.mxu1 %v4139_v40  ;;  %v3707_v43 = vpack.c.bf16 %v3919_v36, %v3911_v0  ;;  %3942 = vtanh.f32 %v987_v16  ;;  %v991_v45 = vadd.f32 %v990_v41, %v4474_v49 }
 0x119   : > { %v4555_v44 = vpop.eup %3922  ;;  %v1080_v46 = vadd.f32 %v1079_v42, %v4474_v49  ;;  %v992_v47 = vpop.f32.mrb[23].mxu0  ;;  %v3715_v51 = vpack.c.bf16 %v3921_v39, %v3913_v4  ;;  %3944 = vtanh.f32 %v1076_v18 }
 0x11a   : > { %v1081_v50 = vpop.f32.mrb[23].mxu1  ;;  %v4559_v52 = vpop.eup %3924  ;;  %v993_v53 = vadd.f32 %v992_v47, %v4474_v49  ;;  %3647 = vmatmul.mubr.msk.f32.gmra.mrb[38].mxu0 %vm1354_vm2, %v4551_v37  ;;  %3708 = vmatprep.subr.bf16.mxu0 %v3707_v43  ;;  %3946 = vtanh.f32 %v991_v45 }
 0x11b   : > { %v1082_v54 = vadd.f32 %v1081_v50, %v4474_v49  ;;  %v3927_v55 = vpop.eup %3926  ;;  %3651 = vmatmul.mubr.msk.f32.gmra.mrb[38].mxu1 %vm1354_vm2, %v4551_v37  ;;  %3716 = vmatprep.subr.bf16.mxu1 %v3715_v51  ;;  %3948 = vtanh.f32 %v1080_v46  ;;  %v1150_v57 = vpop.f32.mrb[24].mxu0 }
 0x11c   : > { %v3929_v56 = vpop.eup %3928  ;;  %3710 = vmatpush1.bf16.msra.mxu0 %v3709_v19  ;;  %3718 = vmatpush1.bf16.msra.mxu1 %v3717_v38  ;;  %v1239_v58 = vpop.f32.mrb[24].mxu1  ;;  %3950 = vtanh.f32 %v993_v53  ;;  %v1151_v60 = vadd.f32 %v1150_v57, %v4456_v5 }
 0x11d   : > { %v3931_v59 = vpop.eup %3930  ;;  %v1240_v61 = vadd.f32 %v1239_v58, %v4456_v5  ;;  %1609 = vmatprep.mubr.f32.mxu0 %v4139_v40  ;;  %1698 = vmatprep.mubr.f32.mxu1 %v4139_v40  ;;  %v1152_v62 = vpop.f32.mrb[25].mxu0  ;;  %3952 = vtanh.f32 %v1082_v54 }
 0x11e   : > { %v1241_v63 = vpop.f32.mrb[25].mxu1  ;;  %v3933_v0 = vpop.eup %3932  ;;  %v1153_v4 = vadd.f32 %v1152_v62, %v4456_v5  ;;  %v3721_v7 = vpack.c.bf16 %v3931_v59, %v4555_v44  ;;  %3954 = vtanh.f32 %v1151_v60 }
 0x11f   : > { %v1242_v6 = vadd.f32 %v1241_v63, %v4456_v5  ;;  %v3935_v8 = vpop.eup %3934  ;;  %3652 = vmatmul.mubr.msk.f32.vlgmr.msra.gmra.mrb[40].mxu0 %vm1354_vm2, %v4501_v17  ;;  %3656 = vmatmul.mubr.msk.f32.vlgmr.msra.gmra.mrb[40].mxu1 %vm1354_vm2, %v4501_v17  ;;  %v3729_v9 = vpack.c.bf16 %v3933_v0, %v4559_v52  ;;  %3956 = vtanh.f32 %v1240_v61  ;;  %v1156_v11 = vpop.f32.mrb[26].mxu0 }
 0x120   : > { %v3937_v10 = vpop.eup %3936  ;;  %v1245_v12 = vpop.f32.mrb[26].mxu1  ;;  %1615 = vmatprep.mubr.f32.mxu0 %v4139_v40  ;;  %1704 = vmatprep.mubr.f32.mxu1 %v4139_v40  ;;  %v3719_v5 = vpack.c.bf16 %v3935_v8, %v3927_v55  ;;  %3958 = vtanh.f32 %v1153_v4  ;;  %v1157_v16 = vadd.f32 %v1156_v11, %v4462_v14 }
 0x121   : > { %v4581_v13 = vpop.eup %3938  ;;  %v1246_v18 = vadd.f32 %v1245_v12, %v4462_v14  ;;  %v1158_v19 = vpop.f32.mrb[27].mxu0  ;;  %v3727_v38 = vpack.c.bf16 %v3937_v10, %v3929_v56  ;;  %3960 = vtanh.f32 %v1242_v6 }
 0x122   : > { %v1247_v36 = vpop.f32.mrb[27].mxu1  ;;  %v4585_v39 = vpop.eup %3940  ;;  %v1159_v41 = vadd.f32 %v1158_v19, %v4462_v14  ;;  %3720 = vmatprep.subr.bf16.mxu0 %v3719_v5  ;;  %3962 = vtanh.f32 %v1157_v16 }
 0x123   : > { %v1248_v42 = vadd.f32 %v1247_v36, %v4462_v14  ;;  %v3943_v43 = vpop.eup %3942  ;;  %3653 = vmatmul.mubr.msk.f32.gmra.mrb[42].mxu0 %vm1354_vm2, %v4516_v48  ;;  %3657 = vmatmul.mubr.msk.f32.gmra.mrb[42].mxu1 %vm1354_vm2, %v4516_v48  ;;  %3964 = vtanh.f32 %v1246_v18  ;;  %v1162_v45 = vpop.f32.mrb[28].mxu0 }
 0x124   : > { %v3945_v44 = vpop.eup %3944  ;;  %3728 = vmatprep.subr.bf16.mxu1 %v3727_v38  ;;  %3722 = vmatpush1.bf16.msra.mxu0 %v3721_v7  ;;  %v1251_v46 = vpop.f32.mrb[28].mxu1  ;;  %3966 = vtanh.f32 %v1159_v41  ;;  %v1163_v14 = vadd.f32 %v1162_v45, %v4464_v15 }
 0x125   : > { %v3947_v47 = vpop.eup %3946  ;;  %3730 = vmatpush1.bf16.msra.mxu1 %v3729_v9  ;;  %v1252_v50 = vadd.f32 %v1251_v46, %v4464_v15  ;;  %1621 = vmatprep.mubr.f32.mxu0 %v4139_v40  ;;  %v1164_v51 = vpop.f32.mrb[29].mxu0  ;;  %3968 = vtanh.f32 %v1248_v42 }
 0x126   : > { %v1253_v52 = vpop.f32.mrb[29].mxu1  ;;  %v3949_v53 = vpop.eup %3948  ;;  %1710 = vmatprep.mubr.f32.mxu1 %v4139_v40  ;;  %v1165_v54 = vadd.f32 %v1164_v51, %v4464_v15  ;;  %v3725_v56 = vpack.c.bf16 %v3947_v47, %v4581_v13  ;;  %3970 = vtanh.f32 %v1163_v14 }
 0x127   : > { %v1254_v55 = vadd.f32 %v1253_v52, %v4464_v15  ;;  %v3951_v57 = vpop.eup %3950  ;;  %3654 = vmatmul.mubr.msk.f32.gmra.mrb[44].mxu0 %vm1354_vm2, %v4534_v2  ;;  %3658 = vmatmul.mubr.msk.f32.gmra.mrb[44].mxu1 %vm1354_vm2, %v4534_v2  ;;  %v3733_v58 = vpack.c.bf16 %v3949_v53, %v4585_v39  ;;  %3972 = vtanh.f32 %v1252_v50  ;;  %v1168_v60 = vpop.f32.mrb[30].mxu0 }
 0x128   : > { %v3953_v59 = vpop.eup %3952  ;;  %v1257_v61 = vpop.f32.mrb[30].mxu1  ;;  %1627 = vmatprep.mubr.f32.mxu0 %v4139_v40  ;;  %1716 = vmatprep.mubr.f32.mxu1 %v4139_v40  ;;  %v3723_v15 = vpack.c.bf16 %v3951_v57, %v3943_v43  ;;  %3974 = vtanh.f32 %v1165_v54  ;;  %v1169_v63 = vadd.f32 %v1168_v60, %v4474_v49 }
 0x129   : > { %v3955_v62 = vpop.eup %3954  ;;  %v1258_v0 = vadd.f32 %v1257_v61, %v4474_v49  ;;  %v1170_v4 = vpop.f32.mrb[31].mxu0  ;;  %v3731_v7 = vpack.c.bf16 %v3953_v59, %v3945_v44  ;;  %3976 = vtanh.f32 %v1254_v55 }
 0x12a   : > { %v1259_v6 = vpop.f32.mrb[31].mxu1  ;;  %v3957_v8 = vpop.eup %3956  ;;  %v1171_v9 = vadd.f32 %v1170_v4, %v4474_v49  ;;  %3724 = vmatprep.subr.bf16.mxu0 %v3723_v15  ;;  %3978 = vtanh.f32 %v1169_v63 }
 0x12b   : > { %v1260_v10 = vadd.f32 %v1259_v6, %v4474_v49  ;;  %v3959_v11 = vpop.eup %3958  ;;  %3655 = vmatmul.mubr.msk.f32.gmra.mrb[46].mxu0 %vm1354_vm2, %v4551_v37  ;;  %3659 = vmatmul.mubr.msk.f32.gmra.mrb[46].mxu1 %vm1354_vm2, %v4551_v37  ;;  %3980 = vtanh.f32 %v1258_v0 }
 0x12c   : > { %v3961_v12 = vpop.eup %3960  ;;  %3732 = vmatprep.subr.bf16.mxu1 %v3731_v7  ;;  %3726 = vmatpush1.bf16.msra.mxu0 %v3725_v56  ;;  %3982 = vtanh.f32 %v1171_v9 }
 0x12d   : > { %v3963_v5 = vpop.eup %3962  ;;  %3734 = vmatpush1.bf16.msra.mxu1 %v3733_v58  ;;  %1787 = vmatprep.mubr.f32.mxu0 %v4139_v40  ;;  %3984 = vtanh.f32 %v1260_v10 }
 0x12e   : > { %v3965_v13 = vpop.eup %3964  ;;  %1876 = vmatprep.mubr.f32.mxu1 %v4139_v40  ;;  %v3737_v49 = vpack.c.bf16 %v3963_v5, %v3955_v62 }
 0x12f   : > { %v3967_v16 = vpop.eup %3966  ;;  %3660 = vmatmul.mubr.msk.f32.vlgmr.msra.gmra.mrb[48].mxu0 %vm1354_vm2, %v4501_v17  ;;  %v3745_v18 = vpack.c.bf16 %v3965_v13, %v3957_v8 }
 0x130   : > { %v3969_v19 = vpop.eup %3968  ;;  %3664 = vmatmul.mubr.msk.f32.vlgmr.msra.gmra.mrb[48].mxu1 %vm1354_vm2, %v4501_v17  ;;  %1793 = vmatprep.mubr.f32.mxu0 %v4139_v40  ;;  %v3735_v36 = vpack.c.bf16 %v3967_v16, %v3959_v11 }
 0x131   : > { %v3971_v38 = vpop.eup %3970  ;;  %1882 = vmatprep.mubr.f32.mxu1 %v4139_v40  ;;  %v3743_v39 = vpack.c.bf16 %v3969_v19, %v3961_v12 }
 0x132   : > { %v3973_v41 = vpop.eup %3972  ;;  %3736 = vmatprep.subr.bf16.mxu0 %v3735_v36 }
 0x133   : > { %v3975_v42 = vpop.eup %3974  ;;  %3661 = vmatmul.mubr.msk.f32.gmra.mrb[50].mxu0 %vm1354_vm2, %v4516_v48  ;;  %3744 = vmatprep.subr.bf16.mxu1 %v3743_v39 }
 0x134   : > { %v3977_v43 = vpop.eup %3976  ;;  %3665 = vmatmul.mubr.msk.f32.gmra.mrb[50].mxu1 %vm1354_vm2, %v4516_v48  ;;  %3738 = vmatpush1.bf16.msra.mxu0 %v3737_v49 }
 0x135   : > { %v3979_v44 = vpop.eup %3978  ;;  %3746 = vmatpush1.bf16.msra.mxu1 %v3745_v18  ;;  %1799 = vmatprep.mubr.f32.mxu0 %v4139_v40 }
 0x136   : > { %v3981_v45 = vpop.eup %3980  ;;  %1888 = vmatprep.mubr.f32.mxu1 %v4139_v40  ;;  %v3741_v46 = vpack.c.bf16 %v3979_v44, %v3971_v38 }
 0x137   : > { %v3983_v47 = vpop.eup %3982  ;;  %3662 = vmatmul.mubr.msk.f32.gmra.mrb[52].mxu0 %vm1354_vm2, %v4534_v2  ;;  %v3749_v14 = vpack.c.bf16 %v3981_v45, %v3973_v41 }
 0x138   : > { %v3985_v50 = vpop.eup %3984  ;;  %3666 = vmatmul.mubr.msk.f32.gmra.mrb[52].mxu1 %vm1354_vm2, %v4534_v2  ;;  %1805 = vmatprep.mubr.f32.mxu0 %v4139_v40  ;;  %v3739_v51 = vpack.c.bf16 %v3983_v47, %v3975_v42 }
 0x139   : > { %1894 = vmatprep.mubr.f32.mxu1 %v4139_v40  ;;  %v3747_v52 = vpack.c.bf16 %v3985_v50, %v3977_v43 }
 0x13a   : > { %3740 = vmatprep.subr.bf16.mxu0 %v3739_v51 }
 0x13b   : > { %3663 = vmatmul.mubr.msk.f32.gmra.mrb[54].mxu0 %vm1354_vm2, %v4551_v37  ;;  %3748 = vmatprep.subr.bf16.mxu1 %v3747_v52 }
 0x13c   : > { %3667 = vmatmul.mubr.msk.f32.gmra.mrb[54].mxu1 %vm1354_vm2, %v4551_v37  ;;  %3742 = vmatpush1.bf16.msra.mxu0 %v3741_v46 }
 0x13d   : > { %3750 = vmatpush1.bf16.msra.mxu1 %v3749_v14  ;;  %1965 = vmatprep.mubr.f32.mxu0 %v4139_v40 }
 0x13e   : > { %2054 = vmatprep.mubr.f32.mxu1 %v4139_v40 }
 0x13f   : > { %3668 = vmatmul.mubr.msk.f32.vlgmr.msra.gmra.mrb[56].mxu0 %vm1354_vm2, %v4501_v17 }
 0x140   : > { %3672 = vmatmul.mubr.msk.f32.vlgmr.msra.gmra.mrb[56].mxu1 %vm1354_vm2, %v4501_v17  ;;  %1971 = vmatprep.mubr.f32.mxu0 %v4139_v40  ;;  %v4665_v17 = vpop.permute.xlu0 %1336 }
 0x141   : > { %2060 = vmatprep.mubr.f32.mxu1 %v4139_v40 }
 0x143   : > { %3669 = vmatmul.mubr.msk.f32.gmra.mrb[58].mxu0 %vm1354_vm2, %v4516_v48 }
 0x144   : > { %3673 = vmatmul.mubr.msk.f32.gmra.mrb[58].mxu1 %vm1354_vm2, %v4516_v48  ;;  %1977 = vmatprep.mubr.f32.mxu0 %v4139_v40  ;;  %v4677_v6 = vpop.permute.xlu0 %1346 }
 0x145   : > { %2066 = vmatprep.mubr.f32.mxu1 %v4139_v40 }
 0x147   : > { %3670 = vmatmul.mubr.msk.f32.gmra.mrb[60].mxu0 %vm1354_vm2, %v4534_v2 }
 0x148   : > { %3674 = vmatmul.mubr.msk.f32.gmra.mrb[60].mxu1 %vm1354_vm2, %v4534_v2  ;;  %1983 = vmatprep.mubr.f32.mxu0 %v4139_v40 }
 0x149   : > { %2072 = vmatprep.mubr.f32.mxu1 %v4139_v40 }
 0x14b   : > { %3671 = vmatmul.mubr.msk.f32.gmra.mrb[62].mxu0 %vm1354_vm2, %v4551_v37 }
 0x14c   : > { %3675 = vmatmul.mubr.msk.f32.gmra.mrb[62].mxu1 %vm1354_vm2, %v4551_v37  ;;  %2221 = vmatprep.mubr.f32.mxu0 %v4139_v40  ;;  %v4671_v37 = vpop.permute.xlu1 %1341 }
 0x14d   : > { %2292 = vmatprep.mubr.f32.mxu1 %v4139_v40 }
 0x150   : > { %v4683_v49 = vpop.permute.xlu1 %1351 }
 0x1e1   : > { %v1433_v48 = vpop.f32.mrb[32].mxu0 }
 0x1e2   : > { %v1434_v53 = vadd.f32 %v1433_v48, %v4665_v17  ;;  %v1522_v2 = vpop.f32.mrb[32].mxu1  ;;  %v1435_v54 = vpop.f32.mrb[33].mxu0 }
 0x1e3   : > { %v1523_v55 = vadd.f32 %v1522_v2, %v4665_v17  ;;  %v1436_v56 = vadd.f32 %v1435_v54, %v4665_v17  ;;  %v1524_v57 = vpop.f32.mrb[33].mxu1 }
 0x1e4   : > { %3986 = vtanh.f32 %v1434_v53  ;;  %v1525_v58 = vadd.f32 %v1524_v57, %v4665_v17 }
 0x1e5   : > { %3988 = vtanh.f32 %v1523_v55  ;;  %v1439_v59 = vpop.f32.mrb[34].mxu0 }
 0x1e6   : > { %3990 = vtanh.f32 %v1436_v56  ;;  %v1440_v60 = vadd.f32 %v1439_v59, %v4671_v37  ;;  %v1528_v61 = vpop.f32.mrb[34].mxu1  ;;  %v1441_v15 = vpop.f32.mrb[35].mxu0 }
 0x1e7   : > { %3992 = vtanh.f32 %v1525_v58  ;;  %v1529_v62 = vadd.f32 %v1528_v61, %v4671_v37  ;;  %v1442_v63 = vadd.f32 %v1441_v15, %v4671_v37  ;;  %v1530_v0 = vpop.f32.mrb[35].mxu1 }
 0x1e8   : > { %3994 = vtanh.f32 %v1440_v60  ;;  %v1531_v4 = vadd.f32 %v1530_v0, %v4671_v37 }
 0x1e9   : > { %3996 = vtanh.f32 %v1529_v62  ;;  %v1445_v7 = vpop.f32.mrb[36].mxu0 }
 0x1ea   : > { %3998 = vtanh.f32 %v1442_v63  ;;  %v1446_v8 = vadd.f32 %v1445_v7, %v4677_v6  ;;  %v1534_v9 = vpop.f32.mrb[36].mxu1  ;;  %v1447_v10 = vpop.f32.mrb[37].mxu0 }
 0x1eb   : > { %4000 = vtanh.f32 %v1531_v4  ;;  %v1535_v11 = vadd.f32 %v1534_v9, %v4677_v6  ;;  %v1448_v12 = vadd.f32 %v1447_v10, %v4677_v6  ;;  %v1536_v5 = vpop.f32.mrb[37].mxu1 }
 0x1ec   : > { %4002 = vtanh.f32 %v1446_v8  ;;  %v1537_v13 = vadd.f32 %v1536_v5, %v4677_v6 }
 0x1ed   : > { %4004 = vtanh.f32 %v1535_v11  ;;  %v1451_v16 = vpop.f32.mrb[38].mxu0 }
 0x1ee   : > { %v3987_v18 = vpop.eup %3986  ;;  %4006 = vtanh.f32 %v1448_v12  ;;  %v1452_v19 = vadd.f32 %v1451_v16, %v4683_v49  ;;  %v1540_v36 = vpop.f32.mrb[38].mxu1 }
 0x1ef   : > { %v1453_v38 = vpop.f32.mrb[39].mxu0  ;;  %v3989_v39 = vpop.eup %3988  ;;  %4008 = vtanh.f32 %v1537_v13  ;;  %v1541_v41 = vadd.f32 %v1540_v36, %v4683_v49 }
 0x1f0   : > { %v1454_v42 = vadd.f32 %v1453_v38, %v4683_v49  ;;  %v1542_v43 = vpop.f32.mrb[39].mxu1  ;;  %v3991_v44 = vpop.eup %3990  ;;  %4010 = vtanh.f32 %v1452_v19 }
 0x1f1   : > { %v1543_v45 = vadd.f32 %v1542_v43, %v4683_v49  ;;  %v3993_v46 = vpop.eup %3992  ;;  %4012 = vtanh.f32 %v1541_v41 }
 0x1f2   : > { %v3995_v47 = vpop.eup %3994  ;;  %4014 = vtanh.f32 %v1454_v42  ;;  %v1611_v14 = vpop.f32.mrb[40].mxu0 }
 0x1f3   : > { %v1700_v50 = vpop.f32.mrb[40].mxu1  ;;  %v3997_v51 = vpop.eup %3996  ;;  %4016 = vtanh.f32 %v1543_v45  ;;  %v1612_v52 = vadd.f32 %v1611_v14, %v4665_v17  ;;  %v3753_v54 = vpack.c.bf16 %v3995_v47, %v3987_v18 }
 0x1f4   : > { %v1701_v48 = vadd.f32 %v1700_v50, %v4665_v17  ;;  %v1613_v53 = vpop.f32.mrb[41].mxu0  ;;  %v1702_v2 = vpop.f32.mrb[41].mxu1  ;;  %v3761_v58 = vpack.c.bf16 %v3997_v51, %v3989_v39 }
 0x1f5   : > { %v3999_v55 = vpop.eup %3998  ;;  %v1614_v56 = vadd.f32 %v1613_v53, %v4665_v17  ;;  %v1703_v57 = vadd.f32 %v1702_v2, %v4665_v17  ;;  %4018 = vtanh.f32 %v1612_v52 }
 0x1f6   : > { %v4001_v59 = vpop.eup %4000  ;;  %v3751_v60 = vpack.c.bf16 %v3999_v55, %v3991_v44  ;;  %4020 = vtanh.f32 %v1701_v48  ;;  %v1617_v15 = vpop.f32.mrb[42].mxu0 }
 0x1f7   : > { %v4003_v61 = vpop.eup %4002  ;;  %v1706_v62 = vpop.f32.mrb[42].mxu1  ;;  %v3759_v63 = vpack.c.bf16 %v4001_v59, %v3993_v46  ;;  %4022 = vtanh.f32 %v1614_v56  ;;  %v1618_v4 = vadd.f32 %v1617_v15, %v4671_v37  ;;  %v4708_v59 = vld [vmem:[%s5036_s7] sm:$0x1] }
 0x1f8   : > { %v4005_v0 = vpop.eup %4004  ;;  %v1707_v7 = vadd.f32 %v1706_v62, %v4671_v37  ;;  %v1619_v8 = vpop.f32.mrb[43].mxu0  ;;  %3752 = vmatprep.subr.bf16.mxu0 %v3751_v60  ;;  %4024 = vtanh.f32 %v1703_v57 }
 0x1f9   : > { %v1708_v9 = vpop.f32.mrb[43].mxu1  ;;  %v4007_v10 = vpop.eup %4006  ;;  %v1620_v11 = vadd.f32 %v1619_v8, %v4671_v37  ;;  %3760 = vmatprep.subr.bf16.mxu1 %v3759_v63  ;;  %3754 = vmatpush1.bf16.msra.mxu0 %v3753_v54  ;;  %4026 = vtanh.f32 %v1618_v4 }
 0x1fa   : > { %v1709_v12 = vadd.f32 %v1708_v9, %v4671_v37  ;;  %v4009_v5 = vpop.eup %4008  ;;  %3762 = vmatpush1.bf16.msra.mxu1 %v3761_v58  ;;  %4028 = vtanh.f32 %v1707_v7  ;;  %v1623_v16 = vpop.f32.mrb[44].mxu0 }
 0x1fb   : > { %v4011_v13 = vpop.eup %4010  ;;  %v1712_v18 = vpop.f32.mrb[44].mxu1  ;;  %4030 = vtanh.f32 %v1620_v11  ;;  %v1624_v36 = vadd.f32 %v1623_v16, %v4677_v6 }
 0x1fc   : > { %v4013_v19 = vpop.eup %4012  ;;  %v1713_v38 = vadd.f32 %v1712_v18, %v4677_v6  ;;  %v1625_v39 = vpop.f32.mrb[45].mxu0  ;;  %v3757_v42 = vpack.c.bf16 %v4011_v13, %v4003_v61  ;;  %4032 = vtanh.f32 %v1709_v12 }
 0x1fd   : > { %v1714_v41 = vpop.f32.mrb[45].mxu1  ;;  %v4015_v43 = vpop.eup %4014  ;;  %v1626_v44 = vadd.f32 %v1625_v39, %v4677_v6  ;;  %v3765_v46 = vpack.c.bf16 %v4013_v19, %v4005_v0  ;;  %4034 = vtanh.f32 %v1624_v36 }
 0x1fe   : > { %v1715_v45 = vadd.f32 %v1714_v41, %v4677_v6  ;;  %v4017_v47 = vpop.eup %4016  ;;  %v3755_v14 = vpack.c.bf16 %v4015_v43, %v4007_v10  ;;  %4036 = vtanh.f32 %v1713_v38  ;;  %v1629_v50 = vpop.f32.mrb[46].mxu0 }
 0x1ff   : > { %v1718_v51 = vpop.f32.mrb[46].mxu1  ;;  %v3763_v52 = vpack.c.bf16 %v4017_v47, %v4009_v5  ;;  %v4019_v48 = vpop.eup %4018  ;;  %4038 = vtanh.f32 %v1626_v44  ;;  %v1630_v53 = vadd.f32 %v1629_v50, %v4683_v49 }
 0x200   : > { %v1719_v2 = vadd.f32 %v1718_v51, %v4683_v49  ;;  %v1631_v54 = vpop.f32.mrb[47].mxu0  ;;  %v1720_v55 = vpop.f32.mrb[47].mxu1  ;;  %3756 = vmatprep.subr.bf16.mxu0 %v3755_v14  ;;  %4040 = vtanh.f32 %v1715_v45 }
 0x201   : > { %v4021_v56 = vpop.eup %4020  ;;  %v1632_v57 = vadd.f32 %v1631_v54, %v4683_v49  ;;  %v1721_v58 = vadd.f32 %v1720_v55, %v4683_v49  ;;  %3764 = vmatprep.subr.bf16.mxu1 %v3763_v52  ;;  %3758 = vmatpush1.bf16.msra.mxu0 %v3757_v42  ;;  %4042 = vtanh.f32 %v1630_v53 }
 0x202   : > { %v4023_v60 = vpop.eup %4022  ;;  %3766 = vmatpush1.bf16.msra.mxu1 %v3765_v46  ;;  %4044 = vtanh.f32 %v1719_v2  ;;  %v1789_v15 = vpop.f32.mrb[48].mxu0 }
 0x203   : > { %v4025_v61 = vpop.eup %4024  ;;  %4046 = vtanh.f32 %v1632_v57  ;;  %v1790_v63 = vadd.f32 %v1789_v15, %v4665_v17  ;;  %v1878_v0 = vpop.f32.mrb[48].mxu1 }
 0x204   : > { %v4027_v62 = vpop.eup %4026  ;;  %v1791_v4 = vpop.f32.mrb[49].mxu0  ;;  %3676 = vmatmul.mubr.msk.f32.vlgmr.msra.gmra.mrb[64].mxu0 %vm1354_vm2, %v4708_v59  ;;  %4048 = vtanh.f32 %v1721_v58  ;;  %v1879_v8 = vadd.f32 %v1878_v0, %v4665_v17 }
 0x205   : > { %v4029_v7 = vpop.eup %4028  ;;  %v1792_v9 = vadd.f32 %v1791_v4, %v4665_v17  ;;  %v1880_v10 = vpop.f32.mrb[49].mxu1  ;;  %3677 = vmatmul.mubr.msk.f32.vlgmr.msra.gmra.mrb[64].mxu1 %vm1354_vm2, %v4708_v59  ;;  %v3769_v11 = vpack.c.bf16 %v4027_v62, %v4019_v48  ;;  %2363 = vmatprep.mubr.f32.mxu0 %v4139_v40  ;;  %4050 = vtanh.f32 %v1790_v63 }
 0x206   : > { %v4031_v12 = vpop.eup %4030  ;;  %v1881_v5 = vadd.f32 %v1880_v10, %v4665_v17  ;;  %v3777_v13 = vpack.c.bf16 %v4029_v7, %v4021_v56  ;;  %2434 = vmatprep.mubr.f32.mxu1 %v4139_v40  ;;  %4052 = vtanh.f32 %v1879_v8  ;;  %v1795_v18 = vpop.f32.mrb[50].mxu0 }
 0x207   : > { %v4033_v16 = vpop.eup %4032  ;;  %v3767_v19 = vpack.c.bf16 %v4031_v12, %v4023_v60  ;;  %4054 = vtanh.f32 %v1792_v9  ;;  %v1796_v38 = vadd.f32 %v1795_v18, %v4671_v37  ;;  %v1884_v39 = vpop.f32.mrb[50].mxu1 }
 0x208   : > { %v4035_v36 = vpop.eup %4034  ;;  %v1797_v41 = vpop.f32.mrb[51].mxu0  ;;  %v3775_v42 = vpack.c.bf16 %v4033_v16, %v4025_v61  ;;  %4056 = vtanh.f32 %v1881_v5  ;;  %v1885_v44 = vadd.f32 %v1884_v39, %v4671_v37 }
 0x209   : > { %v4037_v43 = vpop.eup %4036  ;;  %v1798_v45 = vadd.f32 %v1797_v41, %v4671_v37  ;;  %v1886_v46 = vpop.f32.mrb[51].mxu1  ;;  %3768 = vmatprep.subr.bf16.mxu0 %v3767_v19  ;;  %4058 = vtanh.f32 %v1796_v38 }
 0x20a   : > { %v4039_v47 = vpop.eup %4038  ;;  %v1887_v14 = vadd.f32 %v1886_v46, %v4671_v37  ;;  %3776 = vmatprep.subr.bf16.mxu1 %v3775_v42  ;;  %3770 = vmatpush1.bf16.msra.mxu0 %v3769_v11  ;;  %4060 = vtanh.f32 %v1885_v44  ;;  %v1801_v51 = vpop.f32.mrb[52].mxu0 }
 0x20b   : > { %v4041_v50 = vpop.eup %4040  ;;  %3778 = vmatpush1.bf16.msra.mxu1 %v3777_v13  ;;  %4062 = vtanh.f32 %v1798_v45  ;;  %v1802_v48 = vadd.f32 %v1801_v51, %v4677_v6  ;;  %v1890_v53 = vpop.f32.mrb[52].mxu1 }
 0x20c   : > { %v4043_v52 = vpop.eup %4042  ;;  %v1803_v2 = vpop.f32.mrb[53].mxu0  ;;  %4064 = vtanh.f32 %v1887_v14  ;;  %v1891_v55 = vadd.f32 %v1890_v53, %v4677_v6 }
 0x20d   : > { %v4045_v54 = vpop.eup %4044  ;;  %v1804_v56 = vadd.f32 %v1803_v2, %v4677_v6  ;;  %v1892_v57 = vpop.f32.mrb[53].mxu1  ;;  %v3773_v58 = vpack.c.bf16 %v4043_v52, %v4035_v36  ;;  %4066 = vtanh.f32 %v1802_v48 }
 0x20e   : > { %v4047_v60 = vpop.eup %4046  ;;  %v1893_v61 = vadd.f32 %v1892_v57, %v4677_v6  ;;  %v3781_v15 = vpack.c.bf16 %v4045_v54, %v4037_v43  ;;  %4068 = vtanh.f32 %v1891_v55  ;;  %v1807_v63 = vpop.f32.mrb[54].mxu0 }
 0x20f   : > { %v4049_v62 = vpop.eup %4048  ;;  %v3771_v0 = vpack.c.bf16 %v4047_v60, %v4039_v47  ;;  %4070 = vtanh.f32 %v1804_v56  ;;  %v1808_v7 = vadd.f32 %v1807_v63, %v4683_v49  ;;  %v1896_v8 = vpop.f32.mrb[54].mxu1 }
 0x210   : > { %v4051_v4 = vpop.eup %4050  ;;  %v1809_v9 = vpop.f32.mrb[55].mxu0  ;;  %v3779_v10 = vpack.c.bf16 %v4049_v62, %v4041_v50  ;;  %4072 = vtanh.f32 %v1893_v61  ;;  %v1897_v12 = vadd.f32 %v1896_v8, %v4683_v49 }
 0x211   : > { %v4053_v11 = vpop.eup %4052  ;;  %v1810_v5 = vadd.f32 %v1809_v9, %v4683_v49  ;;  %v1898_v13 = vpop.f32.mrb[55].mxu1  ;;  %3772 = vmatprep.subr.bf16.mxu0 %v3771_v0  ;;  %4074 = vtanh.f32 %v1808_v7 }
 0x212   : > { %v4055_v16 = vpop.eup %4054  ;;  %v1899_v18 = vadd.f32 %v1898_v13, %v4683_v49  ;;  %3780 = vmatprep.subr.bf16.mxu1 %v3779_v10  ;;  %3774 = vmatpush1.bf16.msra.mxu0 %v3773_v58  ;;  %4076 = vtanh.f32 %v1897_v12  ;;  %v1967_v36 = vpop.f32.mrb[56].mxu0 }
 0x213   : > { %v4057_v19 = vpop.eup %4056  ;;  %3782 = vmatpush1.bf16.msra.mxu1 %v3781_v15  ;;  %4078 = vtanh.f32 %v1810_v5  ;;  %v1968_v39 = vadd.f32 %v1967_v36, %v4665_v17  ;;  %v2056_v41 = vpop.f32.mrb[56].mxu1 }
 0x214   : > { %v4059_v38 = vpop.eup %4058  ;;  %v1969_v42 = vpop.f32.mrb[57].mxu0  ;;  %4080 = vtanh.f32 %v1899_v18  ;;  %v2057_v44 = vadd.f32 %v2056_v41, %v4665_v17 }
 0x215   : > { %v4061_v43 = vpop.eup %4060  ;;  %v1970_v45 = vadd.f32 %v1969_v42, %v4665_v17  ;;  %v2058_v46 = vpop.f32.mrb[57].mxu1  ;;  %3678 = vmatmul.mubr.msk.f32.vlgmr.msra.gmra.mrb[66].mxu0 %vm1354_vm2, %v4708_v59  ;;  %v3785_v47 = vpack.c.bf16 %v4059_v38, %v4051_v4  ;;  %4082 = vtanh.f32 %v1968_v39 }
 0x216   : > { %v4063_v14 = vpop.eup %4062  ;;  %v2059_v50 = vadd.f32 %v2058_v46, %v4665_v17  ;;  %3679 = vmatmul.mubr.msk.f32.vlgmr.msra.gmra.mrb[66].mxu1 %vm1354_vm2, %v4708_v59  ;;  %v3793_v51 = vpack.c.bf16 %v4061_v43, %v4053_v11  ;;  %2505 = vmatprep.mubr.f32.mxu0 %v4139_v40  ;;  %4084 = vtanh.f32 %v2057_v44  ;;  %v1973_v48 = vpop.f32.mrb[58].mxu0 }
 0x217   : > { %v4065_v52 = vpop.eup %4064  ;;  %v3783_v53 = vpack.c.bf16 %v4063_v14, %v4055_v16  ;;  %2576 = vmatprep.mubr.f32.mxu1 %v4139_v40  ;;  %4086 = vtanh.f32 %v1970_v45  ;;  %v1974_v54 = vadd.f32 %v1973_v48, %v4671_v37  ;;  %v2062_v55 = vpop.f32.mrb[58].mxu1 }
 0x218   : > { %v4067_v2 = vpop.eup %4066  ;;  %v1975_v56 = vpop.f32.mrb[59].mxu0  ;;  %v3791_v57 = vpack.c.bf16 %v4065_v52, %v4057_v19  ;;  %4088 = vtanh.f32 %v2059_v50  ;;  %v2063_v58 = vadd.f32 %v2062_v55, %v4671_v37 }
 0x219   : > { %v4069_v17 = vpop.eup %4068  ;;  %v1976_v60 = vadd.f32 %v1975_v56, %v4671_v37  ;;  %v2064_v61 = vpop.f32.mrb[59].mxu1  ;;  %3784 = vmatprep.subr.bf16.mxu0 %v3783_v53  ;;  %4090 = vtanh.f32 %v1974_v54 }
 0x21a   : > { %v4071_v15 = vpop.eup %4070  ;;  %v2065_v62 = vadd.f32 %v2064_v61, %v4671_v37  ;;  %3792 = vmatprep.subr.bf16.mxu1 %v3791_v57  ;;  %3786 = vmatpush1.bf16.msra.mxu0 %v3785_v47  ;;  %4092 = vtanh.f32 %v2063_v58  ;;  %v1979_v0 = vpop.f32.mrb[60].mxu0 }
 0x21b   : > { %v4073_v63 = vpop.eup %4072  ;;  %3794 = vmatpush1.bf16.msra.mxu1 %v3793_v51  ;;  %4094 = vtanh.f32 %v1976_v60  ;;  %v1980_v7 = vadd.f32 %v1979_v0, %v4677_v6  ;;  %v2068_v8 = vpop.f32.mrb[60].mxu1 }
 0x21c   : > { %v4075_v4 = vpop.eup %4074  ;;  %v1981_v9 = vpop.f32.mrb[61].mxu0  ;;  %4096 = vtanh.f32 %v2065_v62  ;;  %v2069_v11 = vadd.f32 %v2068_v8, %v4677_v6 }
 0x21d   : > { %v4077_v10 = vpop.eup %4076  ;;  %v1982_v12 = vadd.f32 %v1981_v9, %v4677_v6  ;;  %v2070_v5 = vpop.f32.mrb[61].mxu1  ;;  %v3789_v37 = vpack.c.bf16 %v4075_v4, %v4067_v2  ;;  %4098 = vtanh.f32 %v1980_v7 }
 0x21e   : > { %v4079_v13 = vpop.eup %4078  ;;  %v2071_v16 = vadd.f32 %v2070_v5, %v4677_v6  ;;  %v3797_v18 = vpack.c.bf16 %v4077_v10, %v4069_v17  ;;  %4100 = vtanh.f32 %v2069_v11  ;;  %v1985_v36 = vpop.f32.mrb[62].mxu0  ;;  %v2741_v11 = vld [vmem:[%s4233_s22] sm:$0xff] }
 0x21f   : > { %v4081_v19 = vpop.eup %4080  ;;  %v3787_v38 = vpack.c.bf16 %v4079_v13, %v4071_v15  ;;  %4102 = vtanh.f32 %v1982_v12  ;;  %v1986_v41 = vadd.f32 %v1985_v36, %v4683_v49  ;;  %v2074_v42 = vpop.f32.mrb[62].mxu1 }
 0x220   : > { %v4083_v39 = vpop.eup %4082  ;;  %v1987_v43 = vpop.f32.mrb[63].mxu0  ;;  %v3795_v44 = vpack.c.bf16 %v4081_v19, %v4073_v63  ;;  %4104 = vtanh.f32 %v2071_v16  ;;  %v2075_v46 = vadd.f32 %v2074_v42, %v4683_v49 }
 0x221   : > { %v4085_v45 = vpop.eup %4084  ;;  %v1988_v47 = vadd.f32 %v1987_v43, %v4683_v49  ;;  %v2076_v14 = vpop.f32.mrb[63].mxu1  ;;  %3788 = vmatprep.subr.bf16.mxu0 %v3787_v38  ;;  %4106 = vtanh.f32 %v1986_v41 }
 0x222   : > { %v4087_v6 = vpop.eup %4086  ;;  %v2077_v50 = vadd.f32 %v2076_v14, %v4683_v49  ;;  %3796 = vmatprep.subr.bf16.mxu1 %v3795_v44  ;;  %3790 = vmatpush1.bf16.msra.mxu0 %v3789_v37  ;;  %4108 = vtanh.f32 %v2075_v46  ;;  %v2148_v10 = vpop.permute.xlu0 %2147 }
 0x223   : > { %v4089_v51 = vpop.eup %4088  ;;  %3798 = vmatpush1.bf16.msra.mxu1 %v3797_v18  ;;  %4110 = vtanh.f32 %v1988_v47 }
 0x224   : > { %v4091_v52 = vpop.eup %4090  ;;  %4112 = vtanh.f32 %v2077_v50 }
 0x225   : > { %v4093_v48 = vpop.eup %4092  ;;  %3680 = vmatmul.mubr.msk.f32.vlgmr.msra.gmra.mrb[68].mxu0 %vm1354_vm2, %v4708_v59  ;;  %v3801_v53 = vpack.c.bf16 %v4091_v52, %v4083_v39 }
 0x226   : > { %v4095_v2 = vpop.eup %4094  ;;  %3681 = vmatmul.mubr.msk.f32.vlgmr.msra.gmra.mrb[68].mxu1 %vm1354_vm2, %v4708_v59  ;;  %v3809_v54 = vpack.c.bf16 %v4093_v48, %v4085_v45  ;;  %2647 = vmatprep.mubr.f32.mxu0 %v4139_v40 }
 0x227   : > { %v4097_v49 = vpop.eup %4096  ;;  %v3799_v55 = vpack.c.bf16 %v4095_v2, %v4087_v6  ;;  %2718 = vmatprep.mubr.f32.mxu1 %v4139_v40  ;;  %v4765_v40 = vshrl.u32 %v413_v1, 7 }
 0x228   : > { %v4099_v56 = vpop.eup %4098  ;;  %v3807_v57 = vpack.c.bf16 %v4097_v49, %v4089_v51 }
 0x229   : > { %v4101_v17 = vpop.eup %4100  ;;  %3800 = vmatprep.subr.bf16.mxu0 %v3799_v55  ;;  %v4768_v9 = vsub.s32 0, %v4765_v40  ;;  %v2755_v12 = vsub.s32 2, %v4765_v40  ;;  %v2751_v5 = vsub.s32 1, %v4765_v40  ;;  %v2759_v37 = vsub.s32 3, %v4765_v40 }
 0x22a   : > { %v4103_v58 = vpop.eup %4102  ;;  %3808 = vmatprep.subr.bf16.mxu1 %v3807_v57  ;;  %3802 = vmatpush1.bf16.msra.mxu0 %v3801_v53 }
 0x22b   : > { %v4105_v60 = vpop.eup %4104  ;;  %3810 = vmatpush1.bf16.msra.mxu1 %v3809_v54  ;;  %v4775_v13 = vrot.slane %v2148_v10, %v4768_v9  ;;  %v2748_v16 = vrot.slane %v2741_v11, %v4768_v9  ;;  %v2756_v36 = vrot.slane %v2741_v11, %v2755_v12  ;;  %v2752_v38 = vrot.slane %v2741_v11, %v2751_v5 }
 0x22c   : > { %v4107_v61 = vpop.eup %4106  ;;  %v2760_v43 = vrot.slane %v2741_v11, %v2759_v37 }
 0x22d   : > { %v4109_v15 = vpop.eup %4108  ;;  %v3805_v62 = vpack.c.bf16 %v4107_v61, %v4099_v56 }
 0x22e   : > { %v4111_v63 = vpop.eup %4110  ;;  %v3813_v0 = vpack.c.bf16 %v4109_v15, %v4101_v17 }
 0x22f   : > { %v4113_v4 = vpop.eup %4112  ;;  %v3803_v7 = vpack.c.bf16 %v4111_v63, %v4103_v58  ;;  %v2771_v63 = vsub.s32 6, %v4765_v40 }
 0x230   : > { %v3811_v8 = vpack.c.bf16 %v4113_v4, %v4105_v60 }
 0x231   : > { %3804 = vmatprep.subr.bf16.mxu0 %v3803_v7  ;;  %v2775_v7 = vsub.s32 7, %v4765_v40 }
 0x232   : > { %3812 = vmatprep.subr.bf16.mxu1 %v3811_v8  ;;  %3806 = vmatpush1.bf16.msra.mxu0 %v3805_v62  ;;  %v2763_v62 = vsub.s32 4, %v4765_v40 }
 0x233   : > { %3814 = vmatpush1.bf16.msra.mxu1 %v3813_v0  ;;  %v2767_v0 = vsub.s32 5, %v4765_v40 }
 0x234   : > { %v2764_v8 = vrot.slane %v2741_v11, %v2763_v62 }
 0x235   : > { %3682 = vmatmul.mubr.msk.f32.vlgmr.msra.gmra.mrb[70].mxu0 %vm1354_vm2, %v4708_v59 }
 0x236   : > { %3683 = vmatmul.mubr.msk.f32.vlgmr.msra.gmra.mrb[70].mxu1 %vm1354_vm2, %v4708_v59  ;;  %v4141_v59 = vmov 1966171168   ;;  %vm2740_vm2 = vcmp.lt.s32.totalorder %v4287_v35, 96 }
 0x237   : > { %v2896_v18 = vunpack.c.l.s4 %v4141_v59  ;;  %v2768_v59 = vrot.slane %v2741_v11, %v2767_v0 }
 0x239   : > { %v2897_v14 = vunpack.c.0.s8 %v2896_v18 }
 0x23b   : > { %v4793_v56 = vsub.s32 %v2897_v14, %v4765_v40 }
 0x2d7   : > { %v2223_v19 = vpop.f32.mrb[64].mxu0 }
 0x2d8   : > { %v2224_v39 = vadd.f32 %v2223_v19, %v4775_v13  ;;  %v2294_v41 = vpop.f32.mrb[64].mxu1  ;;  %v2225_v42 = vpop.f32.mrb[65].mxu0 }
 0x2d9   : > { %v2295_v44 = vadd.f32 %v2294_v41, %v4775_v13  ;;  %v2226_v45 = vadd.f32 %v2225_v42, %v4775_v13  ;;  %v2296_v46 = vpop.f32.mrb[65].mxu1 }
 0x2da   : > { %v2825_v47 = vsub.f32 %v2224_v39, %v2748_v16  ;;  %v2297_v6 = vadd.f32 %v2296_v46, %v4775_v13  ;;  %v2772_v16 = vrot.slane %v2741_v11, %v2771_v63 }
 0x2db   : > { %v2827_v50 = vsub.f32 %v2295_v44, %v2756_v36  ;;  %v2826_v51 = vsub.f32 %v2226_v45, %v2752_v38  ;;  %v2776_v38 = vrot.slane %v2741_v11, %v2775_v7 }
 0x2dc   : > { %v2841_v52 = vsel %vm2725_vm3, %v2825_v47, 0.0  ;;  %v2828_v48 = vsub.f32 %v2297_v6, %v2760_v43 }
 0x2dd   : > { %v2859_v53 = vmul.f32 %v2841_v52, %v2841_v52  ;;  %v2843_v2 = vsel %vm2727_vm4, %v2827_v50, 0.0  ;;  %v2842_v54 = vsel %vm2726_vm5, %v2826_v51, 0.0 }
 0x2de   : > { %v2861_v49 = vmul.f32 %v2843_v2, %v2843_v2  ;;  %v2860_v55 = vmul.f32 %v2842_v54, %v2842_v54  ;;  %v2844_v57 = vsel %vm2728_vm6, %v2828_v48, 0.0 }
 0x2df   : > { %v2862_v17 = vmul.f32 %v2844_v57, %v2844_v57  ;;  %v2742_v57 = vld [vmem:[%s4233_s22 + $0x8] sm:$0xff] }
 0x2e0   : > { %v2891_v58 = vcombine.low %v2859_v53, %v2860_v55 }
 0x2e1   : > { %v2892_v60 = vcombine.low %v2861_v49, %v2862_v17 }
 0x2e2   : > { %v2901_v61 = vrot.slane %v2891_v58, %v4793_v56  ;;  %v2780_v58 = vrot.slane %v2742_v57, %v4768_v9 }
 0x2e3   : > { %v2908_v15 = vrot.slane %v2892_v60, %v4793_v56 }
 0x2e5   : > { %v2923_v4 = vcombine.low %v2901_v61, %v2908_v15 }
 0x2e7   : > { %v2931_v60 = vrot.slane %v2923_v4, %v4793_v56 }
 0x2e8   : > { %v2365_v10 = vpop.f32.mrb[66].mxu0 }
 0x2e9   : > { %v2366_v18 = vadd.f32 %v2365_v10, %v4775_v13  ;;  %v2436_v19 = vpop.f32.mrb[66].mxu1  ;;  %v2367_v36 = vpop.f32.mrb[67].mxu0  ;;  %v2784_v10 = vrot.slane %v2742_v57, %v2751_v5 }
 0x2ea   : > { %v2437_v39 = vadd.f32 %v2436_v19, %v4775_v13  ;;  %v2368_v41 = vadd.f32 %v2367_v36, %v4775_v13  ;;  %v2438_v42 = vpop.f32.mrb[67].mxu1  ;;  %v2792_v36 = vrot.slane %v2742_v57, %v2759_v37 }
 0x2eb   : > { %v2829_v43 = vsub.f32 %v2366_v18, %v2764_v8  ;;  %v2439_v44 = vadd.f32 %v2438_v42, %v4775_v13  ;;  %v2788_v8 = vrot.slane %v2742_v57, %v2755_v12 }
 0x2ec   : > { %v2831_v45 = vsub.f32 %v2437_v39, %v2772_v16  ;;  %v2830_v46 = vsub.f32 %v2368_v41, %v2768_v59  ;;  %v2857_v16 = vld [vmem:[#allocation2] sm:$0xff] }
 0x2ed   : > { %v2845_v11 = vsel %vm2729_vm7, %v2829_v43, 0.0  ;;  %v2832_v47 = vsub.f32 %v2439_v44, %v2776_v38 }
 0x2ee   : > { %v2863_v14 = vmul.f32 %v2845_v11, %v2845_v11  ;;  %v2847_v6 = vsel %vm2731_vm8, %v2831_v45, 0.0  ;;  %v2846_v50 = vsel %vm2730_vm9, %v2830_v46, 0.0 }
 0x2ef   : > { %v2865_v51 = vmul.f32 %v2847_v6, %v2847_v6  ;;  %v2864_v52 = vmul.f32 %v2846_v50, %v2846_v50  ;;  %v2848_v48 = vsel %vm2732_vm10, %v2832_v47, 0.0 }
 0x2f0   : > { %v2866_v53 = vmul.f32 %v2848_v48, %v2848_v48 }
 0x2f1   : > { %v2893_v2 = vcombine.low %v2863_v14, %v2864_v52 }
 0x2f2   : > { %v2894_v54 = vcombine.low %v2865_v51, %v2866_v53 }
 0x2f3   : > { %v2915_v49 = vrot.slane %v2893_v2, %v4793_v56 }
 0x2f4   : > { %v2922_v55 = vrot.slane %v2894_v54, %v4793_v56  ;;  %v2796_v54 = vrot.slane %v2742_v57, %v2763_v62 }
 0x2f6   : > { %v2924_v17 = vcombine.low %v2915_v49, %v2922_v55  ;;  %v2804_v55 = vrot.slane %v2742_v57, %v2771_v63 }
 0x2f8   : > { %v2938_v61 = vrot.slane %v2924_v17, %v4793_v56  ;;  %v2507_v15 = vpop.f32.mrb[68].mxu0  ;;  %v2800_v17 = vrot.slane %v2742_v57, %v2767_v0 }
 0x2f9   : > { %v2508_v59 = vadd.f32 %v2507_v15, %v4775_v13  ;;  %v2578_v18 = vpop.f32.mrb[68].mxu1  ;;  %v2509_v19 = vpop.f32.mrb[69].mxu0  ;;  %v2808_v15 = vrot.slane %v2742_v57, %v2775_v7 }
 0x2fa   : > { %v2939_v9 = vcombine.low %v2931_v60, %v2938_v61  ;;  %v2579_v4 = vadd.f32 %v2578_v18, %v4775_v13  ;;  %v2510_v38 = vadd.f32 %v2509_v19, %v4775_v13  ;;  %v2580_v39 = vpop.f32.mrb[69].mxu1 }
 0x2fb   : > { %v2833_v12 = vsub.f32 %v2508_v59, %v2780_v58  ;;  %v2581_v5 = vadd.f32 %v2580_v39, %v4775_v13 }
 0x2fc   : > { %v2991_v41 = vadd.f32 %v2939_v9, %v2857_v16  ;;  %v2835_v42 = vsub.f32 %v2579_v4, %v2788_v8  ;;  %v2834_v43 = vsub.f32 %v2510_v38, %v2784_v10 }
 0x2fd   : > { %v2849_v37 = vsel %vm2733_vm11, %v2833_v12, 0.0  ;;  %v2836_v44 = vsub.f32 %v2581_v5, %v2792_v36 }
 0x2fe   : > { %2993 = vst [vmem:[#allocation2] sm:$0xff] %v2991_v41  ;;  %v2867_v45 = vmul.f32 %v2849_v37, %v2849_v37  ;;  %v2851_v46 = vsel %vm2735_vm12, %v2835_v42, 0.0  ;;  %v2850_v11 = vsel %vm2734_vm13, %v2834_v43, 0.0  ;;  %v2858_v37 = vld [vmem:[#allocation2 + $0x8] sm:$0xff] }
 0x2ff   : > { %v2869_v47 = vmul.f32 %v2851_v46, %v2851_v46  ;;  %v2868_v14 = vmul.f32 %v2850_v11, %v2850_v11  ;;  %v2852_v6 = vsel %vm2736_vm14, %v2836_v44, 0.0 }
 0x300   : > { %v2870_v50 = vmul.f32 %v2852_v6, %v2852_v6 }
 0x301   : > { %v2940_v51 = vcombine.low %v2867_v45, %v2868_v14 }
 0x302   : > { %v2941_v52 = vcombine.low %v2869_v47, %v2870_v50 }
 0x303   : > { %v2950_v48 = vrot.slane %v2940_v51, %v4793_v56 }
 0x304   : > { %v2957_v53 = vrot.slane %v2941_v52, %v4793_v56 }
 0x306   : > { %v2972_v2 = vcombine.low %v2950_v48, %v2957_v53 }
 0x308   : > { %v2649_v49 = vpop.f32.mrb[70].mxu0  ;;  %v2980_v42 = vrot.slane %v2972_v2, %v4793_v56 }
 0x309   : > { %v2650_v58 = vadd.f32 %v2649_v49, %v4775_v13  ;;  %v2720_v60 = vpop.f32.mrb[70].mxu1  ;;  %v2651_v61 = vpop.f32.mrb[71].mxu0 }
 0x30a   : > { %v2721_v8 = vadd.f32 %v2720_v60, %v4775_v13  ;;  %v2652_v62 = vadd.f32 %v2651_v61, %v4775_v13  ;;  %v2722_v10 = vpop.f32.mrb[71].mxu1 }
 0x30b   : > { %v2837_v16 = vsub.f32 %v2650_v58, %v2796_v54  ;;  %v2723_v63 = vadd.f32 %v2722_v10, %v4775_v13 }
 0x30c   : > { %v2839_v0 = vsub.f32 %v2721_v8, %v2804_v55  ;;  %v2838_v59 = vsub.f32 %v2652_v62, %v2800_v17 }
 0x30d   : > { %v2853_v40 = vsel %vm2737_vm15, %v2837_v16, 0.0  ;;  %v2840_v7 = vsub.f32 %v2723_v63, %v2808_v15 }
 0x30e   : > { %v2871_v57 = vmul.f32 %v2853_v40, %v2853_v40  ;;  %v2855_v18 = vsel %vm2739_vm0, %v2839_v0, 0.0  ;;  %v2854_v19 = vsel %vm2738_vm1, %v2838_v59, 0.0 }
 0x30f   : > { %v2873_v36 = vmul.f32 %v2855_v18, %v2855_v18  ;;  %v2872_v9 = vmul.f32 %v2854_v19, %v2854_v19  ;;  %v2856_v4 = vsel %vm2740_vm2, %v2840_v7, 0.0 }
 0x310   : > { %v2874_v38 = vmul.f32 %v2856_v4, %v2856_v4 }
 0x311   : > { %v2942_v39 = vcombine.low %v2871_v57, %v2872_v9 }
 0x312   : > { %v2943_v12 = vcombine.low %v2873_v36, %v2874_v38 }
 0x313   : > { %v2964_v5 = vrot.slane %v2942_v39, %v4793_v56 }
 0x314   : > { %v2971_v41 = vrot.slane %v2943_v12, %v4793_v56 }
 0x316   : > { %v2973_v13 = vcombine.low %v2964_v5, %v2971_v41 }
 0x318   : > { %v2987_v43 = vrot.slane %v2973_v13, %v4793_v56 }
 0x31a   : > { %v2988_v44 = vcombine.low %v2980_v42, %v2987_v43 }
 0x31c   : > { %v2992_v45 = vadd.f32 %v2988_v44, %v2858_v37 }
 0x31e   : > { %2994 = vst [vmem:[#allocation2 + $0x8] sm:$0xff] %v2992_v45 }
 0x31f PF: > { %p3684_p7 = scmp.ge.s32.totalorder %s4214_s15, 128 }
 0x320   : > { %vm2999_vm3 = vcmp.lt.s32.totalorder (!%p3684_p7), %v4257_v20, 128  ;;  %vm3000_vm4 = vcmp.lt.s32.totalorder (!%p3684_p7), %v4259_v21, 128  ;;  %vm3001_vm5 = vcmp.lt.s32.totalorder (!%p3684_p7), %v4261_v22, 128  ;;  %vm3002_vm6 = vcmp.lt.s32.totalorder (!%p3684_p7), %v4263_v23, 128  ;;  %v3015_v46 = vld [vmem:[%s4247_s28] sm:$0xff] (!%p3684_p7)  ;;  %v3016_v36 = vld [vmem:[%s4247_s28 + $0x8] sm:$0xff] (!%p3684_p7) }
 0x321   : > { %2998 = sbr.rel (%p3684_p7) target bundleno = 837 (0x345), region = 68  ;;  %vm3003_vm7 = vcmp.lt.s32.totalorder (!%p3684_p7), %v4265_v24, 128  ;;  %v4866_v56 = vshrl.u32 (!%p3684_p7), %v413_v1, 7  ;;  %vm3004_vm8 = vcmp.lt.s32.totalorder (!%p3684_p7), %v4267_v25, 128  ;;  %vm3005_vm9 = vcmp.lt.s32.totalorder (!%p3684_p7), %v4269_v26, 128 }
 0x322   : > { %vm3006_vm10 = vcmp.lt.s32.totalorder (!%p3684_p7), %v4271_v27, 128  ;;  %v4142_v11 = vmov (!%p3684_p7), 1966171168   ;;  %vm3007_vm11 = vcmp.lt.s32.totalorder (!%p3684_p7), %v4273_v28, 128  ;;  %vm3008_vm12 = vcmp.lt.s32.totalorder (!%p3684_p7), %v4275_v29, 128 }
 0x323   : > { %v3154_v47 = vunpack.c.l.s4 (!%p3684_p7), %v4142_v11  ;;  %v3021_v14 = vsub.s32 (!%p3684_p7), 0, %v4866_v56  ;;  %v3025_v6 = vsub.s32 (!%p3684_p7), 1, %v4866_v56  ;;  %v3029_v50 = vsub.s32 (!%p3684_p7), 2, %v4866_v56 }
 0x324   : > { %v3033_v51 = vsub.s32 (!%p3684_p7), 3, %v4866_v56  ;;  %v3037_v52 = vsub.s32 (!%p3684_p7), 4, %v4866_v56  ;;  %v3041_v48 = vsub.s32 (!%p3684_p7), 5, %v4866_v56  ;;  %v3045_v53 = vsub.s32 (!%p3684_p7), 6, %v4866_v56 }
 0x325   : > { %v3049_v2 = vsub.s32 (!%p3684_p7), 7, %v4866_v56  ;;  %v3022_v54 = vrot.slane (!%p3684_p7), %v3015_v46, %v3021_v14  ;;  %v3026_v49 = vrot.slane (!%p3684_p7), %v3015_v46, %v3025_v6  ;;  %v3030_v55 = vrot.slane (!%p3684_p7), %v3015_v46, %v3029_v50 }
 0x326   : > { %v3034_v17 = vrot.slane (!%p3684_p7), %v3015_v46, %v3033_v51  ;;  %vm3009_vm13 = vcmp.lt.s32.totalorder (!%p3684_p7), %v4277_v30, 128  ;;  %v3038_v58 = vrot.slane (!%p3684_p7), %v3015_v46, %v3037_v52  ;;  %v3042_v60 = vrot.slane (!%p3684_p7), %v3015_v46, %v3041_v48 }
 0x327   : > { %v3046_v61 = vrot.slane (!%p3684_p7), %v3015_v46, %v3045_v53  ;;  %v3050_v15 = vrot.slane (!%p3684_p7), %v3015_v46, %v3049_v2  ;;  %vm3010_vm14 = vcmp.lt.s32.totalorder (!%p3684_p7), %v4279_v31, 128  ;;  %vm3011_vm15 = vcmp.lt.s32.totalorder (!%p3684_p7), %v4281_v32, 128 }
 0x328   : > { %v3099_v8 = vsel %vm2999_vm3, %v3022_v54, 0.0  ;;  %v3100_v62 = vsel %vm3000_vm4, %v3026_v49, 0.0  ;;  %v3101_v10 = vsel %vm3001_vm5, %v3030_v55, 0.0  ;;  %v3102_v16 = vsel %vm3002_vm6, %v3034_v17, 0.0  ;;  %v3115_v49 = vld [vmem:[#allocation3] sm:$0xff] }
 0x329   : > { %v3103_v63 = vsel %vm3003_vm7, %v3038_v58, 0.0  ;;  %v3104_v0 = vsel %vm3004_vm8, %v3042_v60, 0.0  ;;  %v3105_v20 = vsel %vm3005_vm9, %v3046_v61, 0.0  ;;  %v3106_v21 = vsel %vm3006_vm10, %v3050_v15, 0.0 }
 0x32a   : > { %v3117_v59 = vmul.f32 %v3099_v8, %v3099_v8  ;;  %v3118_v40 = vmul.f32 %v3100_v62, %v3100_v62  ;;  %v3119_v7 = vmul.f32 %v3101_v10, %v3101_v10  ;;  %v3120_v22 = vmul.f32 %v3102_v16, %v3102_v16 }
 0x32b   : > { %v3121_v57 = vmul.f32 %v3103_v63, %v3103_v63  ;;  %v3122_v18 = vmul.f32 %v3104_v0, %v3104_v0  ;;  %v3123_v23 = vmul.f32 %v3105_v20, %v3105_v20  ;;  %v3124_v19 = vmul.f32 %v3106_v21, %v3106_v21 }
 0x32c   : > { %v3149_v24 = vcombine.low %v3117_v59, %v3118_v40  ;;  %v3150_v9 = vcombine.low %v3119_v7, %v3120_v22  ;;  %v3155_v4 = vunpack.c.0.s8 %v3154_v47  ;;  %vm3012_vm0 = vcmp.lt.s32.totalorder %v4283_v33, 128  ;;  %v3116_v59 = vld [vmem:[#allocation3 + $0x8] sm:$0xff] }
 0x32d   : > { %v3151_v25 = vcombine.low %v3121_v57, %v3122_v18  ;;  %v3152_v26 = vcombine.low %v3123_v23, %v3124_v19  ;;  %vm3013_vm1 = vcmp.lt.s32.totalorder %v4285_v34, 128  ;;  %vm3014_vm2 = vcmp.lt.s32.totalorder %v4287_v35, 128 }
 0x32e   : > { %v3158_v27 = vsub.s32 %v3155_v4, %v4866_v56  ;;  %v3054_v38 = vrot.slane %v3016_v36, %v3021_v14  ;;  %v3058_v39 = vrot.slane %v3016_v36, %v3025_v6  ;;  %v3062_v12 = vrot.slane %v3016_v36, %v3029_v50 }
 0x32f   : > { %v3066_v5 = vrot.slane %v3016_v36, %v3033_v51  ;;  %v3070_v41 = vrot.slane %v3016_v36, %v3037_v52  ;;  %v3074_v13 = vrot.slane %v3016_v36, %v3041_v48  ;;  %v3078_v42 = vrot.slane %v3016_v36, %v3045_v53 }
 0x330   : > { %v3159_v43 = vrot.slane %v3149_v24, %v3158_v27  ;;  %v3166_v37 = vrot.slane %v3150_v9, %v3158_v27  ;;  %v3173_v44 = vrot.slane %v3151_v25, %v3158_v27  ;;  %v3180_v45 = vrot.slane %v3152_v26, %v3158_v27 }
 0x331   : > { %v3082_v46 = vrot.slane %v3016_v36, %v3049_v2  ;;  %v3107_v11 = vsel %vm3007_vm11, %v3054_v38, 0.0  ;;  %v3108_v47 = vsel %vm3008_vm12, %v3058_v39, 0.0  ;;  %v3109_v56 = vsel %vm3009_vm13, %v3062_v12, 0.0 }
 0x332   : > { %v3181_v14 = vcombine.low %v3159_v43, %v3166_v37  ;;  %v3182_v6 = vcombine.low %v3173_v44, %v3180_v45  ;;  %v3110_v50 = vsel %vm3010_vm14, %v3066_v5, 0.0  ;;  %v3111_v51 = vsel %vm3011_vm15, %v3070_v41, 0.0 }
 0x333   : > { %v3112_v52 = vsel %vm3012_vm0, %v3074_v13, 0.0  ;;  %v3113_v28 = vsel %vm3013_vm1, %v3078_v42, 0.0  ;;  %v3114_v29 = vsel %vm3014_vm2, %v3082_v46, 0.0  ;;  %v3125_v48 = vmul.f32 %v3107_v11, %v3107_v11 }
 0x334   : > { %v3189_v30 = vrot.slane %v3181_v14, %v3158_v27  ;;  %v3196_v53 = vrot.slane %v3182_v6, %v3158_v27  ;;  %v3126_v2 = vmul.f32 %v3108_v47, %v3108_v47  ;;  %v3127_v54 = vmul.f32 %v3109_v56, %v3109_v56 }
 0x335   : > { %v3128_v31 = vmul.f32 %v3110_v50, %v3110_v50  ;;  %v3129_v55 = vmul.f32 %v3111_v51, %v3111_v51  ;;  %v3130_v17 = vmul.f32 %v3112_v52, %v3112_v52  ;;  %v3131_v32 = vmul.f32 %v3113_v28, %v3113_v28 }
 0x336   : > { %v3197_v58 = vcombine.low %v3189_v30, %v3196_v53  ;;  %v3132_v60 = vmul.f32 %v3114_v29, %v3114_v29  ;;  %v3198_v33 = vcombine.low %v3125_v48, %v3126_v2 }
 0x337   : > { %v3199_v61 = vcombine.low %v3127_v54, %v3128_v31  ;;  %v3200_v15 = vcombine.low %v3129_v55, %v3130_v17 }
 0x338   : > { %v3249_v34 = vadd.f32 %v3197_v58, %v3115_v49  ;;  %v3201_v8 = vcombine.low %v3131_v32, %v3132_v60  ;;  %v3208_v62 = vrot.slane %v3198_v33, %v3158_v27 }
 0x339   : > { %v3215_v35 = vrot.slane %v3199_v61, %v3158_v27  ;;  %v3222_v10 = vrot.slane %v3200_v15, %v3158_v27 }
 0x33a   : > { %3251 = vst [vmem:[#allocation3] sm:$0xff] %v3249_v34  ;;  %v3229_v16 = vrot.slane %v3201_v8, %v3158_v27 }
 0x33b   : > { %v3230_v63 = vcombine.low %v3208_v62, %v3215_v35 }
 0x33c   : > { %v3231_v0 = vcombine.low %v3222_v10, %v3229_v16 }
 0x33d   : > { %v3238_v20 = vrot.slane %v3230_v63, %v3158_v27 }
 0x33e   : > { %v3245_v21 = vrot.slane %v3231_v0, %v3158_v27 }
 0x340   : > { %v3246_v40 = vcombine.low %v3238_v20, %v3245_v21 }
 0x342   : > { %v3250_v7 = vadd.f32 %v3246_v40, %v3116_v59 }
 0x344   : > { %3252 = vst [vmem:[#allocation3 + $0x8] sm:$0xff] %v3250_v7 }
 0x345 PF: > { %v3261_v22 = vshrl.u32 %v413_v1, 7  ;;  %v3256_v57 = vld [vmem:[#allocation2] sm:$0xff]  ;;  %vm3340_vm3 = vcmask 1040384   ;;  %v3381_v37 = vld [vmem:[#allocation3] sm:$0xff]  ;;  %v4951_v11 = vld [vmem:[#allocation2 + $0x8] sm:$0xff]  ;;  %vm3506_vm4 = vcmp.eq.s32.totalorder %v4219_v3, 1 }
 0x346   : > { %vm3505_vm5 = vcmp.eq.s32.totalorder %v4219_v3, 0 }
 0x347   : > { %v4923_v18 = vsub.s32 0, %v3261_v22  ;;  %v4925_v23 = vsub.s32 1, %v3261_v22  ;;  %v4927_v19 = vsub.s32 2, %v3261_v22  ;;  %v4929_v36 = vsub.s32 3, %v3261_v22 }
 0x348   : > { %v4934_v25 = vsub.s32 4, %v3261_v22  ;;  %v4937_v26 = vsub.s32 5, %v3261_v22  ;;  %v4939_v27 = vsub.s32 6, %v3261_v22  ;;  %v4946_v42 = vsub.s32 7, %v3261_v22 }
 0x349   : > { %v3263_v24 = vrot.slane %v3256_v57, %v4923_v18  ;;  %v3267_v9 = vrot.slane %v3256_v57, %v4925_v23  ;;  %v3271_v4 = vrot.slane %v3256_v57, %v4927_v19  ;;  %v3275_v1 = vrot.slane %v3256_v57, %v4929_v36 }
 0x34a   : > { %v3279_v38 = vrot.slane %v3256_v57, %v4934_v25  ;;  %v3283_v13 = vrot.slane %v3256_v57, %v4937_v26  ;;  %v3287_v45 = vrot.slane %v3256_v57, %v4939_v27  ;;  %v3392_v56 = vrot.slane %v3381_v37, %v4925_v23 }
 0x34b   : > { %v3341_v39 = vsel %vm3340_vm3, %v3263_v24, 0.0  ;;  %v3342_v12 = vsel %vm3340_vm3, %v3267_v9, 0.0  ;;  %v3344_v5 = vsel %vm3340_vm3, %v3271_v4, 0.0  ;;  %v3346_v43 = vsel %vm3340_vm3, %v3275_v1, 0.0  ;;  %v3382_v16 = vld [vmem:[#allocation3 + $0x8] sm:$0xff] }
 0x34c   : > { %v3343_v41 = vadd.f32 %v3342_v12, %v3341_v39  ;;  %v3348_v46 = vsel %vm3340_vm3, %v3279_v38, 0.0  ;;  %v3396_v14 = vrot.slane %v3381_v37, %v4927_v19  ;;  %v3291_v6 = vrot.slane %v3256_v57, %v4946_v42 }
 0x34d   : > { %v3350_v50 = vsel %vm3340_vm3, %v3283_v13, 0.0  ;;  %v3388_v51 = vrot.slane %v3381_v37, %v4923_v18  ;;  %v3400_v28 = vrot.slane %v3381_v37, %v4929_v36  ;;  %v3295_v29 = vrot.slane %v4951_v11, %v4923_v18 }
 0x34e   : > { %v3345_v44 = vadd.f32 %v3344_v5, %v3343_v41  ;;  %v3352_v48 = vsel %vm3340_vm3, %v3287_v45, 0.0  ;;  %v3404_v30 = vrot.slane %v3381_v37, %v4934_v25  ;;  %v3466_v54 = vsel %vm3340_vm3, %v3392_v56, 0.0 }
 0x34f   : > { %v3465_v2 = vsel %vm3340_vm3, %v3388_v51, 0.0  ;;  %v3468_v49 = vsel %vm3340_vm3, %v3396_v14, 0.0  ;;  %v3299_v31 = vrot.slane %v4951_v11, %v4925_v23  ;;  %v3354_v55 = vsel %vm3340_vm3, %v3291_v6, 0.0 }
 0x350   : > { %v3347_v47 = vadd.f32 %v3346_v43, %v3345_v44  ;;  %v3467_v17 = vadd.f32 %v3466_v54, %v3465_v2  ;;  %v3408_v58 = vrot.slane %v3381_v37, %v4937_v26  ;;  %v3470_v60 = vsel %vm3340_vm3, %v3400_v28, 0.0 }
 0x351   : > { %v3303_v33 = vrot.slane %v4951_v11, %v4927_v19  ;;  %v3356_v61 = vsel %vm3340_vm3, %v3295_v29, 0.0  ;;  %v3412_v8 = vrot.slane %v3381_v37, %v4939_v27  ;;  %v3472_v62 = vsel %vm3340_vm3, %v3404_v30, 0.0 }
 0x352   : > { %v3349_v52 = vadd.f32 %v3348_v46, %v3347_v47  ;;  %v3469_v15 = vadd.f32 %v3468_v49, %v3467_v17  ;;  %v3307_v35 = vrot.slane %v4951_v11, %v4929_v36  ;;  %v3358_v10 = vsel %vm3340_vm3, %v3299_v31, 0.0 }
 0x353   : > { %v3416_v20 = vrot.slane %v3381_v37, %v4946_v42  ;;  %v3474_v21 = vsel %vm3340_vm3, %v3408_v58, 0.0  ;;  %v3311_v59 = vrot.slane %v4951_v11, %v4934_v25  ;;  %v3360_v40 = vsel %vm3340_vm3, %v3303_v33, 0.0 }
 0x354   : > { %v3351_v53 = vadd.f32 %v3350_v50, %v3349_v52  ;;  %v3471_v63 = vadd.f32 %v3470_v60, %v3469_v15  ;;  %v3420_v57 = vrot.slane %v3382_v16, %v4923_v18  ;;  %v3476_v24 = vsel %vm3340_vm3, %v3412_v8, 0.0 }
 0x355   : > { %v3315_v9 = vrot.slane %v4951_v11, %v4937_v26  ;;  %v3362_v4 = vsel %vm3340_vm3, %v3307_v35, 0.0  ;;  %v3424_v39 = vrot.slane %v3382_v16, %v4925_v23  ;;  %v3478_v12 = vsel %vm3340_vm3, %v3416_v20, 0.0 }
 0x356   : > { %v3353_v32 = vadd.f32 %v3352_v48, %v3351_v53  ;;  %v3473_v7 = vadd.f32 %v3472_v62, %v3471_v63  ;;  %v3319_v5 = vrot.slane %v4951_v11, %v4939_v27  ;;  %v3364_v41 = vsel %vm3340_vm3, %v3311_v59, 0.0 }
 0x357   : > { %v3428_v43 = vrot.slane %v3382_v16, %v4927_v19  ;;  %v3480_v37 = vsel %vm3340_vm3, %v3420_v57, 0.0  ;;  %v3323_v44 = vrot.slane %v4951_v11, %v4946_v42  ;;  %v3366_v45 = vsel %vm3340_vm3, %v3315_v9, 0.0 }
 0x358   : > { %v3355_v34 = vadd.f32 %v3354_v55, %v3353_v32  ;;  %v3475_v1 = vadd.f32 %v3474_v21, %v3473_v7  ;;  %v3432_v47 = vrot.slane %v3382_v16, %v4929_v36  ;;  %v3482_v56 = vsel %vm3340_vm3, %v3424_v39, 0.0 }
 0x359   : > { %v3368_v14 = vsel %vm3340_vm3, %v3319_v5, 0.0  ;;  %v3436_v51 = vrot.slane %v3382_v16, %v4934_v25  ;;  %v3484_v19 = vsel %vm3340_vm3, %v3428_v43, 0.0  ;;  %v3370_v52 = vsel %vm3340_vm3, %v3323_v44, 0.0 }
 0x35a   : > { %v3357_v0 = vadd.f32 %v3356_v61, %v3355_v34  ;;  %v3477_v13 = vadd.f32 %v3476_v24, %v3475_v1  ;;  %v3440_v29 = vrot.slane %v3382_v16, %v4937_v26  ;;  %v3486_v48 = vsel %vm3340_vm3, %v3432_v47, 0.0 }
 0x35b   : > { %v3444_v53 = vrot.slane %v3382_v16, %v4939_v27  ;;  %v3488_v2 = vsel %vm3340_vm3, %v3436_v51, 0.0  ;;  %v3448_v25 = vrot.slane %v3382_v16, %v4946_v42 }
 0x35c   : > { %v3359_v22 = vadd.f32 %v3358_v10, %v3357_v0  ;;  %v3479_v46 = vadd.f32 %v3478_v12, %v3477_v13  ;;  %v3490_v49 = vsel %vm3340_vm3, %v3440_v29, 0.0 }
 0x35d   : > { %v3492_v55 = vsel %vm3340_vm3, %v3444_v53, 0.0  ;;  %v3494_v26 = vsel %vm3340_vm3, %v3448_v25, 0.0 }
 0x35e   : > { %v3361_v38 = vadd.f32 %v3360_v40, %v3359_v22  ;;  %v3481_v6 = vadd.f32 %v3480_v37, %v3479_v46 }
 0x360   : > { %v3363_v18 = vadd.f32 %v3362_v4, %v3361_v38  ;;  %v3483_v28 = vadd.f32 %v3482_v56, %v3481_v6 }
 0x362   : > { %v3365_v23 = vadd.f32 %v3364_v41, %v3363_v18  ;;  %v3485_v30 = vadd.f32 %v3484_v19, %v3483_v28 }
 0x364   : > { %v3367_v50 = vadd.f32 %v3366_v45, %v3365_v23  ;;  %v3487_v54 = vadd.f32 %v3486_v48, %v3485_v30 }
 0x366   : > { %v3369_v11 = vadd.f32 %v3368_v14, %v3367_v50  ;;  %v3489_v31 = vadd.f32 %v3488_v2, %v3487_v54 }
 0x368   : > { %v3371_v36 = vadd.f32 %v3370_v52, %v3369_v11  ;;  %v3491_v17 = vadd.f32 %v3490_v49, %v3489_v31 }
 0x36a   : > { %3372 = vadd.xlane.f32.xlu0 %v3371_v36  ;;  %v3493_v32 = vadd.f32 %v3492_v55, %v3491_v17 }
 0x36c   : > { %v3495_v58 = vadd.f32 %v3494_v26, %v3493_v32 }
 0x36e   : > { %3496 = vadd.xlane.f32.xlu0 %v3495_v58 }
 0x3f7   : > { %v3373_v60 = vpop.xlane.xlu0 %3372 }
 0x3f8   : > { %v3374_v33 = vrot.slane %v3373_v60, 4 }
 0x3fa   : > { %v3375_v27 = vadd.f32 %v3374_v33, %v3373_v60 }
 0x3fb   : > { %v3497_v34 = vpop.xlane.xlu0 %3496 }
 0x3fc   : > { %v3376_v61 = vrot.slane %v3375_v27, 2  ;;  %v3498_v62 = vrot.slane %v3497_v34, 4 }
 0x3fe   : > { %v3377_v15 = vadd.f32 %v3376_v61, %v3375_v27  ;;  %v3499_v35 = vadd.f32 %v3498_v62, %v3497_v34 }
 0x400   : > { %v3378_v8 = vrot.slane %v3377_v15, 1  ;;  %v3500_v10 = vrot.slane %v3499_v35, 2 }
 0x402   : > { %v3379_v42 = vadd.f32 %v3378_v8, %v3377_v15  ;;  %v3501_v16 = vadd.f32 %v3500_v10, %v3499_v35 }
 0x404   : > { %3815 = vpush %v3379_v42  ;;  %v3502_v63 = vrot.slane %v3501_v16, 1 }
 0x406   : > { %v3503_v0 = vadd.f32 %v3502_v63, %v3501_v16 }
 0x408   : > { %3817 = vpush %v3503_v0 }
 0x435   : > { %s3816_s15 = spop %3815 }
 0x436   : > { %v3509_v21 = vstv %s3816_s15 }
 0x439   : > { %s3818_s22 = spop %3817 }
 0x43a   : > { %v3507_v20 = vstv %s3818_s22 }
 0x43b   : > { %v3508_v59 = vsel %vm3506_vm4, %v3507_v20, 0.0 }
 0x43c   : > { %v3510_v40 = vsel %vm3505_vm5, %v3509_v21, %v3508_v59 }
 0x43d   : > { %3511 = vst [vmem:[%s403_s18] sm:$0x1] %v3510_v40 }
 0x43e PF: > { %s21_s13 = sadd.s32 1, %s4136_s13   ;;  %s5039_s11 = smov %s4132_s12 }
 0x43f   : > { %p18_p8 = scmp.ge.s32.totalorder %s21_s13, 4   ;;  %s5040_s12 = smov %s5042_s8 }
 0x441   :  { %20 = sbr.rel (!%p18_p8) target bundleno = 3 (0x3), region = 108 }

</bundles_post_ra>
